<compile_context>
chip_gen: v5e
topology: v5e:2x2
jax: 0.10.0
libtpu: 0.0.40
codegen_flags: <defaults>
</compile_context>

<pallas_src>
import jax
import jax.numpy as jnp
from jax.experimental import pallas as pl
from jax.experimental.pallas import tpu as pltpu


def _round_up(n, m):
    return ((n + m - 1) // m) * m


def _mlp_kernel(x_ref, w1_ref, b1_ref, w2_ref, b2_ref, w3_ref, b3_ref, o_ref):
    x = x_ref[...]

    # layer1: dense (folded U1@V1) + bias + ReLU
    h = jnp.dot(x, w1_ref[...], preferred_element_type=jnp.float32) + b1_ref[...]
    h = jnp.maximum(h, 0.0)

    # layer2: dense (folded U2@V2) + bias + ReLU
    h = jnp.dot(h, w2_ref[...], preferred_element_type=jnp.float32) + b2_ref[...]
    h = jnp.maximum(h, 0.0)

    # layer3: dense (folded U3@V3, lane-padded to 128) + bias, no activation
    h = jnp.dot(h, w3_ref[...], preferred_element_type=jnp.float32) + b3_ref[...]

    o_ref[...] = h.astype(o_ref.dtype)


def simple_model_ndlinear(x, params, *, batch_tile=512):
    """params = dict with u1,v1,b1,u2,v2,b2,u3,v3,b3 (biases shaped (1, out))."""
    B, D_in = x.shape
    H = params["v1"].shape[1]
    D_out = params["v3"].shape[1]

    # ---- fold low-rank factors into dense per-layer weights (wrapper-side, tiny) ----
    w1 = params["u1"] @ params["v1"]                       # (D_in, H)
    w2 = params["u2"] @ params["v2"]                       # (H, H)
    w3 = params["u3"] @ params["v3"]                       # (H, D_out)
    b1, b2, b3 = params["b1"], params["b2"], params["b3"]

    # ---- lane-dense output: pad layer-3 weight/bias last dim to a multiple of 128 ----
    D_out_pad = max(128, _round_up(D_out, 128))
    w3p = jnp.zeros((H, D_out_pad), jnp.float32).at[:, :D_out].set(w3)
    b3p = jnp.zeros((1, D_out_pad), jnp.float32).at[:, :D_out].set(b3)

    # ---- batch tiling: multiple of 8, padded batch, >=2 grid steps when possible ----
    bt = min(batch_tile, _round_up(B, 8))
    bt = _round_up(bt, 8)
    if B <= bt and B >= 16:
        # single-tile batch: split into 2 steps so v7x's 2 TensorCores both get work
        bt = _round_up(pl.cdiv(B, 2), 8)
    B_pad = _round_up(B, bt)
    x_p = x if B_pad == B else jnp.zeros((B_pad, D_in), x.dtype).at[:B, :].set(x)
    grid = (B_pad // bt,)

    # ---- VMEM budget: double-buffered x/out tiles + resident weights + activations ----
    weight_bytes = 4 * (D_in * H + H * H + H * D_out_pad + 2 * H + D_out_pad)
    io_bytes = 4 * 2 * bt * (D_in + D_out_pad)
    act_bytes = 4 * 2 * bt * H
    vmem_bytes = int(1.5 * (2 * weight_bytes + io_bytes + act_bytes))
    vmem_limit = min(max(vmem_bytes, 32 << 20), 60 << 20)   # stay under v7x's 64 MiB/TC

    # ---- cost hint for XLA scheduling ----
    flops = 2 * B_pad * (D_in * H + H * H + H * D_out_pad)
    bytes_accessed = 4 * B_pad * (D_in + D_out_pad) + weight_bytes
    cost = pl.CostEstimate(flops=flops, transcendentals=0, bytes_accessed=bytes_accessed)

    def _const_spec(arr):
        # whole array, same block every grid step (stays resident in VMEM)
        nd = arr.ndim
        return pl.BlockSpec(arr.shape, lambda i, _nd=nd: (0,) * _nd)

    in_specs = [
        pl.BlockSpec((bt, D_in), lambda i: (i, 0)),          # x tile over batch
        _const_spec(w1), _const_spec(b1),
        _const_spec(w2), _const_spec(b2),
        _const_spec(w3p), _const_spec(b3p),
    ]
    out_spec = pl.BlockSpec((bt, D_out_pad), lambda i: (i, 0))

    out_padded = pl.pallas_call(
        _mlp_kernel,
        out_shape=jax.ShapeDtypeStruct((B_pad, D_out_pad), jnp.float32),
        grid_spec=pltpu.PrefetchScalarGridSpec(
            num_scalar_prefetch=0,
            grid=grid,
            in_specs=in_specs,
            out_specs=out_spec,
        ),
        compiler_params=pltpu.CompilerParams(
            dimension_semantics=("parallel",),
            vmem_limit_bytes=vmem_limit,
        ),
        cost_estimate=cost,
    )(x_p, w1, b1, w2, b2, w3p, b3p)

    return out_padded[:B, :D_out]


def init_params(key, input_dim=784, hidden_dim=256, output_dim=10, rank=4):
    ks = jax.random.split(key, 6)

    def low_rank(ku, kv, d_in, d_out):
        u = jax.random.normal(ku, (d_in, rank), jnp.float32) * (1.0 / jnp.sqrt(d_in))
        v = jax.random.normal(kv, (rank, d_out), jnp.float32) * (1.0 / jnp.sqrt(rank))
        b = jnp.zeros((1, d_out), jnp.float32)
        return u, v, b

    u1, v1, b1 = low_rank(ks[0], ks[1], input_dim, hidden_dim)
    u2, v2, b2 = low_rank(ks[2], ks[3], hidden_dim, hidden_dim)
    u3, v3, b3 = low_rank(ks[4], ks[5], hidden_dim, output_dim)
    return dict(u1=u1, v1=v1, b1=b1, u2=u2, v2=v2, b2=b2, u3=u3, v3=v3, b3=b3)


def reference_forward(x, p):
    h = jnp.maximum(x @ p["u1"] @ p["v1"] + p["b1"], 0.0)
    h = jnp.maximum(h @ p["u2"] @ p["v2"] + p["b2"], 0.0)
    return h @ p["u3"] @ p["v3"] + p["b3"]


if __name__ == "__main__":
    key = jax.random.PRNGKey(0)
    k_x, k_p = jax.random.split(key)

    B, D_in = 256, 784
    x = jax.random.normal(k_x, (B, D_in), jnp.float32)
    params = init_params(k_p, input_dim=D_in, hidden_dim=256, output_dim=10, rank=4)

    out = simple_model_ndlinear(x, params, batch_tile=128)   # 2 grid steps at B=256
    out = jax.block_until_ready(out)

    ref = reference_forward(x, params)
    assert out.shape == (B, 10)
    # Folding W = U @ V changes FP associativity slightly -> modestly relaxed tolerance.
    assert jnp.allclose(out, ref, atol=1e-3, rtol=1e-3), "mismatch vs JAX reference"

    print("KERNEL_OK")
</pallas_src>

<mosaic_0001>
module attributes {stable_mosaic.version = 11 : i64} {
  func.func @_mlp_kernel(%arg0: i32, %arg1: memref<128x784xf32, #tpu.memory_space<vmem>>, %arg2: memref<784x256xf32, #tpu.memory_space<vmem>>, %arg3: memref<1x256xf32, #tpu.memory_space<vmem>>, %arg4: memref<256x256xf32, #tpu.memory_space<vmem>>, %arg5: memref<1x256xf32, #tpu.memory_space<vmem>>, %arg6: memref<256x128xf32, #tpu.memory_space<vmem>>, %arg7: memref<1x128xf32, #tpu.memory_space<vmem>>, %arg8: memref<128x128xf32, #tpu.memory_space<vmem>>) attributes {dimension_semantics = [#tpu.dimension_semantics<parallel>], iteration_bounds = array<i64: 2>, scalar_prefetch = 0 : i64, scratch_operands = 0 : i64, tpu.core_type = #tpu.core_type<tc>, window_params = [{transform_indices = @transform_0, window_bounds = array<i64: 128, 784>}, {pipeline_mode = #tpu.pipeline_mode<synchronous>, transform_indices = @transform_1, window_bounds = array<i64: 784, 256>}, {pipeline_mode = #tpu.pipeline_mode<synchronous>, transform_indices = @transform_2, window_bounds = array<i64: 1, 256>}, {pipeline_mode = #tpu.pipeline_mode<synchronous>, transform_indices = @transform_3, window_bounds = array<i64: 256, 256>}, {pipeline_mode = #tpu.pipeline_mode<synchronous>, transform_indices = @transform_4, window_bounds = array<i64: 1, 256>}, {pipeline_mode = #tpu.pipeline_mode<synchronous>, transform_indices = @transform_5, window_bounds = array<i64: 256, 128>}, {pipeline_mode = #tpu.pipeline_mode<synchronous>, transform_indices = @transform_6, window_bounds = array<i64: 1, 128>}, {transform_indices = @transform_7, window_bounds = array<i64: 128, 128>}]} {
    %c0 = arith.constant 0 : index
    %c0_0 = arith.constant 0 : index
    %0 = vector.load %arg1[%c0, %c0_0] : memref<128x784xf32, #tpu.memory_space<vmem>>, vector<128x784xf32>
    %c0_1 = arith.constant 0 : index
    %c0_2 = arith.constant 0 : index
    %1 = vector.load %arg2[%c0_1, %c0_2] : memref<784x256xf32, #tpu.memory_space<vmem>>, vector<784x256xf32>
    %cst = arith.constant dense<0.000000e+00> : vector<128x256xf32>
    %2 = tpu.matmul %0, %1, %cst {dimension_numbers = #tpu.dot_dimension_numbers<[1], [0], [0], [1], [0, 0, 1, 1], [], []>} : vector<128x784xf32>, vector<784x256xf32>, vector<128x256xf32> -> vector<128x256xf32>
    %c0_3 = arith.constant 0 : index
    %c0_4 = arith.constant 0 : index
    %3 = vector.load %arg3[%c0_3, %c0_4] : memref<1x256xf32, #tpu.memory_space<vmem>>, vector<1x256xf32>
    %4 = vector.broadcast %3 : vector<1x256xf32> to vector<128x256xf32>
    %5 = arith.addf %2, %4 : vector<128x256xf32>
    %cst_5 = arith.constant 0.000000e+00 : f32
    %6 = vector.broadcast %cst_5 : f32 to vector<128x256xf32>
    %7 = arith.maximumf %5, %6 : vector<128x256xf32>
    %c0_6 = arith.constant 0 : index
    %c0_7 = arith.constant 0 : index
    %8 = vector.load %arg4[%c0_6, %c0_7] : memref<256x256xf32, #tpu.memory_space<vmem>>, vector<256x256xf32>
    %cst_8 = arith.constant dense<0.000000e+00> : vector<128x256xf32>
    %9 = tpu.matmul %7, %8, %cst_8 {dimension_numbers = #tpu.dot_dimension_numbers<[1], [0], [0], [1], [0, 0, 1, 1], [], []>} : vector<128x256xf32>, vector<256x256xf32>, vector<128x256xf32> -> vector<128x256xf32>
    %c0_9 = arith.constant 0 : index
    %c0_10 = arith.constant 0 : index
    %10 = vector.load %arg5[%c0_9, %c0_10] : memref<1x256xf32, #tpu.memory_space<vmem>>, vector<1x256xf32>
    %11 = vector.broadcast %10 : vector<1x256xf32> to vector<128x256xf32>
    %12 = arith.addf %9, %11 : vector<128x256xf32>
    %cst_11 = arith.constant 0.000000e+00 : f32
    %13 = vector.broadcast %cst_11 : f32 to vector<128x256xf32>
    %14 = arith.maximumf %12, %13 : vector<128x256xf32>
    %c0_12 = arith.constant 0 : index
    %c0_13 = arith.constant 0 : index
    %15 = vector.load %arg6[%c0_12, %c0_13] : memref<256x128xf32, #tpu.memory_space<vmem>>, vector<256x128xf32>
    %cst_14 = arith.constant dense<0.000000e+00> : vector<128x128xf32>
    %16 = tpu.matmul %14, %15, %cst_14 {dimension_numbers = #tpu.dot_dimension_numbers<[1], [0], [0], [1], [0, 0, 1, 1], [], []>} : vector<128x256xf32>, vector<256x128xf32>, vector<128x128xf32> -> vector<128x128xf32>
    %c0_15 = arith.constant 0 : index
    %c0_16 = arith.constant 0 : index
    %17 = vector.load %arg7[%c0_15, %c0_16] : memref<1x128xf32, #tpu.memory_space<vmem>>, vector<1x128xf32>
    %18 = vector.broadcast %17 : vector<1x128xf32> to vector<128x128xf32>
    %19 = arith.addf %16, %18 : vector<128x128xf32>
    %c0_17 = arith.constant 0 : index
    %c0_18 = arith.constant 0 : index
    %20 = vector.load %arg8[%c0_17, %c0_18] : memref<128x128xf32, #tpu.memory_space<vmem>>, vector<128x128xf32>
    tpu.vector_store %arg8[%c0_17, %c0_18], %19 {strides = array<i32>} : memref<128x128xf32, #tpu.memory_space<vmem>>, vector<128x128xf32>,
    return
  }
  func.func @transform_0(%arg0: i32) -> (i32, i32) {
    %c0_i32 = arith.constant 0 : i32
    %c0_i32_0 = arith.constant 0 : i32
    return %arg0, %c0_i32 : i32, i32
  }
  func.func @transform_1(%arg0: i32) -> (i32, i32) {
    %c0_i32 = arith.constant 0 : i32
    %c0_i32_0 = arith.constant 0 : i32
    %c0_i32_1 = arith.constant 0 : i32
    return %c0_i32, %c0_i32_0 : i32, i32
  }
  func.func @transform_2(%arg0: i32) -> (i32, i32) {
    %c0_i32 = arith.constant 0 : i32
    %c0_i32_0 = arith.constant 0 : i32
    %c0_i32_1 = arith.constant 0 : i32
    return %c0_i32, %c0_i32_0 : i32, i32
  }
  func.func @transform_3(%arg0: i32) -> (i32, i32) {
    %c0_i32 = arith.constant 0 : i32
    %c0_i32_0 = arith.constant 0 : i32
    %c0_i32_1 = arith.constant 0 : i32
    return %c0_i32, %c0_i32_0 : i32, i32
  }
  func.func @transform_4(%arg0: i32) -> (i32, i32) {
    %c0_i32 = arith.constant 0 : i32
    %c0_i32_0 = arith.constant 0 : i32
    %c0_i32_1 = arith.constant 0 : i32
    return %c0_i32, %c0_i32_0 : i32, i32
  }
  func.func @transform_5(%arg0: i32) -> (i32, i32) {
    %c0_i32 = arith.constant 0 : i32
    %c0_i32_0 = arith.constant 0 : i32
    %c0_i32_1 = arith.constant 0 : i32
    return %c0_i32, %c0_i32_0 : i32, i32
  }
  func.func @transform_6(%arg0: i32) -> (i32, i32) {
    %c0_i32 = arith.constant 0 : i32
    %c0_i32_0 = arith.constant 0 : i32
    %c0_i32_1 = arith.constant 0 : i32
    return %c0_i32, %c0_i32_0 : i32, i32
  }
  func.func @transform_7(%arg0: i32) -> (i32, i32) {
    %c0_i32 = arith.constant 0 : i32
    %c0_i32_0 = arith.constant 0 : i32
    return %arg0, %c0_i32 : i32, i32
  }
}

</mosaic_0001>

<bundles_post_ra>
// kernel: tpu_custom_call.1
= control target key start
LH: loop header
LB: loop body
LE: loop exit
PB: predicated region body
PF: predicated region fallthrough
CT: control target
= control target key end

     0   :  { %12 = vsyncpa [#allocation3], 0  ;;  %s4449_s0 = inlined_call_operand.vmem [shape: f32[256,784], index: 0, kind: input, shape index: {}]   ;;  %s4450_s1 = inlined_call_operand.vmem [shape: f32[784,256], index: 1, kind: input, shape index: {}]   ;;  %s4451_s2 = inlined_call_operand.vmem [shape: f32[1,256], index: 2, kind: input, shape index: {}]   ;;  %s4452_s3 = inlined_call_operand.vmem [shape: f32[256,256], index: 3, kind: input, shape index: {}]   ;;  %s4453_s4 = inlined_call_operand.vmem [shape: f32[1,256], index: 4, kind: input, shape index: {}]   ;;  %s4454_s5 = inlined_call_operand.vmem [shape: f32[256,128], index: 5, kind: input, shape index: {}]   ;;  %s4455_s6 = inlined_call_operand.vmem [shape: f32[1,128], index: 6, kind: input, shape index: {}]   ;;  %s4456_s7 = inlined_call_operand.hbm [shape: f32[256,128], index: 7, kind: output, shape index: {}]  }
   0x1   :  { %14 = vsyncpa [#allocation3 + $0x1], 0  ;;  %s2474_s24 = smov 0   ;;  %s2476_s25 = smov 0  }
   0x2   :  { %s2478_s26 = smov 0   ;;  %s2480_s27 = smov 0  }
   0x3 LB: > { %s2495_s28 = sadd.s32 4294967295, %s2430_s27   ;;  %s2210_s29 = sadd.s32 4294967294, %s2430_s27   ;;  %s2430_s27 = sphi %s2480_s27, %s4580_s27   ;;  %s2426_s26 = sphi %s2478_s26, %s4579_s26   ;;  %s2422_s25 = sphi %s2476_s25, %s4578_s25   ;;  %s2418_s24 = sphi %s2474_s24, %s4577_s24  }
   0x4   : > { %s2499_s30 = sadd.s32 1, %s2430_s27   ;;  %s179_s8 = sadd.s32 1, %s2426_s26 }
   0x5   : > { %s176_s9 = ssub.s32 %s2430_s27, %s2499_s30  ;;  %p189_p0 = scmp.ne.s32.totalorder %s2426_s26, %s2422_s25 }
   0x6   : > { %p177_p1 = scmp.eq.s32.totalorder %s176_s9, 0  ;;  %p190_p2 = scmp.eq.s32.totalorder %s2495_s28, 1 }
   0x7   : > { %p195_p3 = scmp.ne.s32.totalorder %s2422_s25, %s2418_s24  ;;  %p196_p4 = scmp.eq.s32.totalorder %s2210_s29, 1 }
   0x8   : > { %s2510_s10 = scalar_select %p177_p1, %s2426_s26, %s179_s8  }
   0x9   : > { %p2512_p5 = por %p190_p2, %p189_p0  ;;  %p2516_p6 = por %p196_p4, %p195_p3 }
   0xa   : > { %p2213_p7 = scmp.ge.s32.totalorder %s2430_s27, 1  ;;  %p242_p8 = scmp.lt.s32.totalorder %s2430_s27, 3 }
   0xc   : > { %p243_p9 = pnand %p2213_p7, %p242_p8 }
   0xe   : > { %246 = sbr.rel (%p243_p9) target bundleno = 964 (0x3c4), region = 48 }
  0x13   : > { %v425_v0 = vld [vmem:[%s4450_s1 + $0xf0] sm:$0xff]  ;;  %v423_v2 = vld [vmem:[%s4450_s1 + $0xe0] sm:$0xff]  ;;  %s2215_s13 = sshll.u32 %s2495_s28, 4  ;;  %vm597_vm0 = vcmask 130048   ;;  %s272_s15 = sand.u32 1, %s2422_s25  }
  0x14   : > { %v489_v1 = vld [vmem:[%s4450_s1 + $0x2f0] sm:$0xff]  ;;  %646 = vmatpush.msra.mxu0 %v425_v0  ;;  %v487_v4 = vld [vmem:[%s4450_s1 + $0x2e0] sm:$0xff]  ;;  %p2627_p10 = scmp.lt.s32.totalorder %s2215_s13, 31  ;;  %s2214_s17 = sshll.u32 %s272_s15, 7 }
  0x15   : > { %776 = vmatpush.msra.mxu2 %v489_v1  ;;  %v457_v3 = vld [vmem:[%s4450_s1 + $0x1f0] sm:$0xff]  ;;  %v455_v7 = vld [vmem:[%s4450_s1 + $0x1e0] sm:$0xff]  ;;  %s4382_s18 = scalar_lea.vmem [#allocation2], %s2214_s17  ;;  %s2254_s19 = sshll.u32 %s2495_s28, 7 }
  0x16   : > { %v521_v5 = vld [vmem:[%s4450_s1 + $0x3f0] sm:$0xff]  ;;  %711 = vmatpush.msra.mxu1 %v457_v3  ;;  %647 = vmatpush.msra.mxu0 %v423_v2  ;;  %v519_v9 = vld [vmem:[%s4450_s1 + $0x3e0] sm:$0xff]  ;;  %s4582_s13 = smov (!%p2627_p10, %s2215_s13), 31  ;;  %s2144_s20 = scalar_lea.hbm %s4456_s7, %s2254_s19 }
  0x17   : > { %841 = vmatpush.msra.mxu3 %v521_v5  ;;  %v421_v6 = vld [vmem:[%s4450_s1 + $0xd0] sm:$0xff]  ;;  %777 = vmatpush.msra.mxu2 %v487_v4  ;;  %v419_v11 = vld [vmem:[%s4450_s1 + $0xc0] sm:$0xff]  ;;  %s2255_s21 = smul.u32 56, %s4582_s13  ;;  %s2145_s22 = sshll.u32 %s4382_s18, 4  ;;  %s2146_s22 = int_to_ptr.vmem [resolvable:$true] %s2145_s22 }
  0x18   : > { %v485_v8 = vld [vmem:[%s4450_s1 + $0x2d0] sm:$0xff]  ;;  %712 = vmatpush.msra.mxu1 %v455_v7  ;;  %v483_v12 = vld [vmem:[%s4450_s1 + $0x2c0] sm:$0xff]  ;;  %648 = vmatpush.msra.mxu0 %v421_v6  ;;  %s2147_s23 = sshll.u32 %s2144_s20, 4  ;;  %s2133_s9 = scalar_lea.sflag [#allocation3], %s272_s15  ;;  %s2148_s23 = int_to_ptr.hbm [resolvable:$true] %s2147_s23 }
  0x19   : > { %v453_v10 = vld [vmem:[%s4450_s1 + $0x1d0] sm:$0xff]  ;;  %842 = vmatpush.msra.mxu3 %v519_v9  ;;  %778 = vmatpush.msra.mxu2 %v485_v8  ;;  %v451_v14 = vld [vmem:[%s4450_s1 + $0x1c0] sm:$0xff]  ;;  %s2713_s14 = scalar_lea.vmem %s4449_s0, %s2255_s21  ;;  %s2382_s28 = sshra.s32 %s2148_s23, 4  ;;  %s2383_s28 = int_to_ptr.hbm [resolvable:$true] %s2382_s28 }
  0x1a   : > { %v517_v13 = vld [vmem:[%s4450_s1 + $0x3d0] sm:$0xff]  ;;  %v515_v15 = vld [vmem:[%s4450_s1 + $0x3c0] sm:$0xff]  ;;  %713 = vmatpush.msra.mxu1 %v453_v10  ;;  %649 = vmatpush.msra.mxu0 %v419_v11  ;;  %v284_v3 = vld [vmem:[%s2713_s14 + $0x8] sm:$0xff]  ;;  %s2384_s29 = scalar_lea.hbm %s2383_s28, 128  ;;  %s2388_s13 = scalar_lea.hbm %s4456_s7, 256 }
  0x1b   : > { %843 = vmatpush.msra.mxu3 %v517_v13  ;;  %v417_v16 = vld [vmem:[%s4450_s1 + $0xb0] sm:$0xff]  ;;  %779 = vmatpush.msra.mxu2 %v483_v12  ;;  %v415_v20 = vld [vmem:[%s4450_s1 + $0xa0] sm:$0xff]  ;;  %v286_v4 = vld [vmem:[%s2713_s14 + $0x18] sm:$0xff]  ;;  %p2385_p11 = scmp.ne.s32.totalorder %s2383_s28, %s2384_s29  ;;  %p2389_p0 = scmp.lt.s32.totalorder %s2383_s28, %s4456_s7 }
  0x1c   : > { %v481_v17 = vld [vmem:[%s4450_s1 + $0x2b0] sm:$0xff]  ;;  %714 = vmatpush.msra.mxu1 %v451_v14  ;;  %v479_v21 = vld [vmem:[%s4450_s1 + $0x2a0] sm:$0xff]  ;;  %650 = vmatpush.msra.mxu0 %v417_v16  ;;  %v2759_v10 = vld [vmem:[%s2713_s14 + $0x38] sm:$0xff]  ;;  %p2390_p1 = scmp.lt.s32.totalorder %s2388_s13, %s2384_s29 }
  0x1d   : > { %v449_v18 = vld [vmem:[%s4450_s1 + $0x1b0] sm:$0xff]  ;;  %844 = vmatpush.msra.mxu3 %v515_v15  ;;  %780 = vmatpush.msra.mxu2 %v481_v17  ;;  %v447_v22 = vld [vmem:[%s4450_s1 + $0x1a0] sm:$0xff]  ;;  %v292_v11 = vld [vmem:[%s2713_s14 + $0x48] sm:$0xff]  ;;  %p2386_p12 = pnand %p2385_p11, %p2512_p5 }
  0x1e   : > { %v513_v19 = vld [vmem:[%s4450_s1 + $0x3b0] sm:$0xff]  ;;  %v511_v23 = vld [vmem:[%s4450_s1 + $0x3a0] sm:$0xff]  ;;  %715 = vmatpush.msra.mxu1 %v449_v18  ;;  %651 = vmatpush.msra.mxu0 %v415_v20  ;;  %p2391_p2 = por %p2390_p1, %p2389_p0 }
  0x1f   : > { %845 = vmatpush.msra.mxu3 %v513_v19  ;;  %v413_v24 = vld [vmem:[%s4450_s1 + $0x90] sm:$0xff]  ;;  %781 = vmatpush.msra.mxu2 %v479_v21  ;;  %v411_v28 = vld [vmem:[%s4450_s1 + $0x80] sm:$0xff]  ;;  %p2387_p13 = pneg %p2386_p12 }
  0x20   : > { %v477_v25 = vld [vmem:[%s4450_s1 + $0x290] sm:$0xff]  ;;  %716 = vmatpush.msra.mxu1 %v447_v22  ;;  %v475_v29 = vld [vmem:[%s4450_s1 + $0x280] sm:$0xff]  ;;  %652 = vmatpush.msra.mxu0 %v413_v24  ;;  %v298_v22 = vld [vmem:[%s2713_s14 + $0x78] sm:$0xff] }
  0x21   : > { %v445_v26 = vld [vmem:[%s4450_s1 + $0x190] sm:$0xff]  ;;  %846 = vmatpush.msra.mxu3 %v511_v23  ;;  %782 = vmatpush.msra.mxu2 %v477_v25  ;;  %v443_v30 = vld [vmem:[%s4450_s1 + $0x180] sm:$0xff]  ;;  %v300_v23 = vld [vmem:[%s2713_s14 + $0x88] sm:$0xff]  ;;  %p2392_p3 = pnand %p2391_p2, %p2387_p13 }
  0x22   : > { %v509_v27 = vld [vmem:[%s4450_s1 + $0x390] sm:$0xff]  ;;  %v507_v31 = vld [vmem:[%s4450_s1 + $0x380] sm:$0xff]  ;;  %717 = vmatpush.msra.mxu1 %v445_v26  ;;  %653 = vmatpush.msra.mxu0 %v411_v28  ;;  %v2797_v26 = vld [vmem:[%s2713_s14 + $0xa8] sm:$0xff] }
  0x23   : > { %847 = vmatpush.msra.mxu3 %v509_v27  ;;  %v409_v32 = vld [vmem:[%s4450_s1 + $0x70] sm:$0xff]  ;;  %783 = vmatpush.msra.mxu2 %v475_v29  ;;  %v407_v36 = vld [vmem:[%s4450_s1 + $0x60] sm:$0xff]  ;;  %v306_v27 = vld [vmem:[%s2713_s14 + $0xb8] sm:$0xff] }
  0x24   : > { %v473_v33 = vld [vmem:[%s4450_s1 + $0x270] sm:$0xff]  ;;  %718 = vmatpush.msra.mxu1 %v443_v30  ;;  %v471_v37 = vld [vmem:[%s4450_s1 + $0x260] sm:$0xff]  ;;  %654 = vmatpush.msra.mxu0 %v409_v32 }
  0x25   : > { %v441_v34 = vld [vmem:[%s4450_s1 + $0x170] sm:$0xff]  ;;  %848 = vmatpush.msra.mxu3 %v507_v31  ;;  %784 = vmatpush.msra.mxu2 %v473_v33  ;;  %v439_v38 = vld [vmem:[%s4450_s1 + $0x160] sm:$0xff] }
  0x26   : > { %v505_v35 = vld [vmem:[%s4450_s1 + $0x370] sm:$0xff]  ;;  %v503_v39 = vld [vmem:[%s4450_s1 + $0x360] sm:$0xff]  ;;  %719 = vmatpush.msra.mxu1 %v441_v34  ;;  %655 = vmatpush.msra.mxu0 %v407_v36  ;;  %v312_v34 = vld [vmem:[%s2713_s14 + $0xe8] sm:$0xff] }
  0x27   : > { %849 = vmatpush.msra.mxu3 %v505_v35  ;;  %v405_v40 = vld [vmem:[%s4450_s1 + $0x50] sm:$0xff]  ;;  %785 = vmatpush.msra.mxu2 %v471_v37  ;;  %v403_v44 = vld [vmem:[%s4450_s1 + $0x40] sm:$0xff]  ;;  %v314_v35 = vld [vmem:[%s2713_s14 + $0xf8] sm:$0xff] }
  0x28   : > { %v469_v41 = vld [vmem:[%s4450_s1 + $0x250] sm:$0xff]  ;;  %720 = vmatpush.msra.mxu1 %v439_v38  ;;  %v467_v45 = vld [vmem:[%s4450_s1 + $0x240] sm:$0xff]  ;;  %656 = vmatpush.msra.mxu0 %v405_v40  ;;  %v2823_v38 = vld [vmem:[%s2713_s14 + $0x118] sm:$0xff] }
  0x29   : > { %v437_v42 = vld [vmem:[%s4450_s1 + $0x150] sm:$0xff]  ;;  %850 = vmatpush.msra.mxu3 %v503_v39  ;;  %786 = vmatpush.msra.mxu2 %v469_v41  ;;  %v435_v46 = vld [vmem:[%s4450_s1 + $0x140] sm:$0xff]  ;;  %v320_v39 = vld [vmem:[%s2713_s14 + $0x128] sm:$0xff] }
  0x2a   : > { %v501_v43 = vld [vmem:[%s4450_s1 + $0x350] sm:$0xff]  ;;  %v499_v47 = vld [vmem:[%s4450_s1 + $0x340] sm:$0xff]  ;;  %721 = vmatpush.msra.mxu1 %v437_v42  ;;  %657 = vmatpush.msra.mxu0 %v403_v44 }
  0x2b   : > { %851 = vmatpush.msra.mxu3 %v501_v43  ;;  %v401_v48 = vld [vmem:[%s4450_s1 + $0x30] sm:$0xff]  ;;  %787 = vmatpush.msra.mxu2 %v467_v45  ;;  %v399_v52 = vld [vmem:[%s4450_s1 + $0x20] sm:$0xff] }
  0x2c   : > { %v465_v49 = vld [vmem:[%s4450_s1 + $0x230] sm:$0xff]  ;;  %722 = vmatpush.msra.mxu1 %v435_v46  ;;  %v463_v53 = vld [vmem:[%s4450_s1 + $0x220] sm:$0xff]  ;;  %658 = vmatpush.msra.mxu0 %v401_v48  ;;  %v326_v46 = vld [vmem:[%s2713_s14 + $0x158] sm:$0xff] }
  0x2d   : > { %v433_v50 = vld [vmem:[%s4450_s1 + $0x130] sm:$0xff]  ;;  %852 = vmatpush.msra.mxu3 %v499_v47  ;;  %788 = vmatpush.msra.mxu2 %v465_v49  ;;  %v431_v54 = vld [vmem:[%s4450_s1 + $0x120] sm:$0xff]  ;;  %v328_v47 = vld [vmem:[%s2713_s14 + $0x168] sm:$0xff] }
  0x2e   : > { %v497_v51 = vld [vmem:[%s4450_s1 + $0x330] sm:$0xff]  ;;  %v495_v55 = vld [vmem:[%s4450_s1 + $0x320] sm:$0xff]  ;;  %723 = vmatpush.msra.mxu1 %v433_v50  ;;  %659 = vmatpush.msra.mxu0 %v399_v52  ;;  %v2849_v50 = vld [vmem:[%s2713_s14 + $0x188] sm:$0xff] }
  0x2f   : > { %853 = vmatpush.msra.mxu3 %v497_v51  ;;  %v397_v56 = vld [vmem:[%s4450_s1 + $0x10] sm:$0xff]  ;;  %789 = vmatpush.msra.mxu2 %v463_v53  ;;  %v395_v60 = vld [vmem:[%s4450_s1] sm:$0xff]  ;;  %v334_v51 = vld [vmem:[%s2713_s14 + $0x198] sm:$0xff] }
  0x30   : > { %v461_v57 = vld [vmem:[%s4450_s1 + $0x210] sm:$0xff]  ;;  %724 = vmatpush.msra.mxu1 %v431_v54  ;;  %v459_v61 = vld [vmem:[%s4450_s1 + $0x200] sm:$0xff]  ;;  %660 = vmatpush.msra.mxu0 %v397_v56 }
  0x31   : > { %v429_v58 = vld [vmem:[%s4450_s1 + $0x110] sm:$0xff]  ;;  %854 = vmatpush.msra.mxu3 %v495_v55  ;;  %790 = vmatpush.msra.mxu2 %v461_v57  ;;  %v2728_v62 = vld [vmem:[%s2713_s14] sm:$0xff] }
  0x32   : > { %v493_v59 = vld [vmem:[%s4450_s1 + $0x310] sm:$0xff]  ;;  %725 = vmatpush.msra.mxu1 %v429_v58  ;;  %v427_v1 = vld [vmem:[%s4450_s1 + $0x100] sm:$0xff]  ;;  %661 = vmatpush.msra.mxu0 %v395_v60  ;;  %v340_v58 = vld [vmem:[%s2713_s14 + $0x1c8] sm:$0xff] }
  0x33   : > { %v285_v63 = vld [vmem:[%s2713_s14 + $0x10] sm:$0xff]  ;;  %855 = vmatpush.msra.mxu3 %v493_v59  ;;  %791 = vmatpush.msra.mxu2 %v459_v61  ;;  %v491_v2 = vld [vmem:[%s4450_s1 + $0x300] sm:$0xff]  ;;  %v342_v59 = vld [vmem:[%s2713_s14 + $0x1d8] sm:$0xff] }
  0x34   : > { %v553_v0 = vld [vmem:[%s4450_s1 + $0x4f0] sm:$0xff]  ;;  %662 = vmatmul.f32.vlgmr.msra.gmra.mxu0 %v2728_v62  ;;  %792 = vmatmul.f32.vlgmr.msra.gmra.mxu2 %v285_v63  ;;  %v551_v6 = vld [vmem:[%s4450_s1 + $0x4e0] sm:$0xff]  ;;  %v426_v63 = vld [vmem:[%s4450_s1 + $0xf8] sm:$0xff] }
  0x35   : > { %v585_v5 = vld [vmem:[%s4450_s1 + $0x5f0] sm:$0xff]  ;;  %906 = vmatpush.msrb.mxu0 %v553_v0  ;;  %726 = vmatpush.msra.mxu1 %v427_v1  ;;  %v583_v7 = vld [vmem:[%s4450_s1 + $0x5e0] sm:$0xff]  ;;  %v424_v0 = vld [vmem:[%s4450_s1 + $0xe8] sm:$0xff] }
  0x36   : > { %856 = vmatpush.msra.mxu3 %v491_v2  ;;  %727 = vmatmul.f32.vlgmr.msra.gmra.mxu1 %v284_v3  ;;  %v549_v8 = vld [vmem:[%s4450_s1 + $0x4d0] sm:$0xff]  ;;  %v547_v12 = vld [vmem:[%s4450_s1 + $0x4c0] sm:$0xff]  ;;  %v2881_v1 = vld [vmem:[%s2713_s14 + $0x1f8] sm:$0xff] }
  0x37   : > { %857 = vmatmul.f32.vlgmr.msra.gmra.mxu3 %v286_v4  ;;  %971 = vmatpush.msrb.mxu1 %v585_v5  ;;  %v581_v9 = vld [vmem:[%s4450_s1 + $0x5d0] sm:$0xff]  ;;  %v579_v13 = vld [vmem:[%s4450_s1 + $0x5c0] sm:$0xff]  ;;  %v348_v2 = vld [vmem:[%s2713_s14 + $0x208] sm:$0xff] }
  0x38   : > { %907 = vmatpush.msrb.mxu0 %v551_v6  ;;  %v291_v14 = vld [vmem:[%s2713_s14 + $0x40] sm:$0xff]  ;;  %v293_v15 = vld [vmem:[%s2713_s14 + $0x50] sm:$0xff]  ;;  %1101 = vmatpush.msrb.mxu3 %v426_v63  ;;  %v422_v3 = vld [vmem:[%s4450_s1 + $0xd8] sm:$0xff] }
  0x39   : > { %972 = vmatpush.msrb.mxu1 %v583_v7  ;;  %v545_v16 = vld [vmem:[%s4450_s1 + $0x4b0] sm:$0xff]  ;;  %v543_v18 = vld [vmem:[%s4450_s1 + $0x4a0] sm:$0xff]  ;;  %v420_v7 = vld [vmem:[%s4450_s1 + $0xc8] sm:$0xff] }
  0x3a   : > { %908 = vmatpush.msrb.mxu0 %v549_v8  ;;  %v577_v17 = vld [vmem:[%s4450_s1 + $0x5b0] sm:$0xff]  ;;  %v575_v19 = vld [vmem:[%s4450_s1 + $0x5a0] sm:$0xff]  ;;  %1102 = vmatpush.msrb.mxu3 %v424_v0  ;;  %v390_v63 = vld [vmem:[%s2713_s14 + $0x358] sm:$0xff] }
  0x3b   : > { %973 = vmatpush.msrb.mxu1 %v581_v9  ;;  %v2784_v20 = vld [vmem:[%s2713_s14 + $0x70] sm:$0xff]  ;;  %v299_v21 = vld [vmem:[%s2713_s14 + $0x80] sm:$0xff]  ;;  %v418_v9 = vld [vmem:[%s4450_s1 + $0xb8] sm:$0xff] }
  0x3c   : > { %665 = vmatmul.f32.gmra.mxu0 %v2759_v10  ;;  %795 = vmatmul.f32.gmra.mxu2 %v292_v11  ;;  %v541_v24 = vld [vmem:[%s4450_s1 + $0x490] sm:$0xff]  ;;  %v307_v29 = vld [vmem:[%s2713_s14 + $0xc0] sm:$0xff] }
  0x3d   : > { %909 = vmatpush.msrb.mxu0 %v547_v12  ;;  %974 = vmatpush.msrb.mxu1 %v579_v13  ;;  %v573_v25 = vld [vmem:[%s4450_s1 + $0x590] sm:$0xff]  ;;  %v539_v30 = vld [vmem:[%s4450_s1 + $0x480] sm:$0xff]  ;;  %v416_v13 = vld [vmem:[%s4450_s1 + $0xa8] sm:$0xff] }
  0x3e   : > { %730 = vmatmul.f32.gmra.mxu1 %v291_v14  ;;  %v305_v28 = vld [vmem:[%s2713_s14 + $0xb0] sm:$0xff]  ;;  %v571_v31 = vld [vmem:[%s4450_s1 + $0x580] sm:$0xff]  ;;  %1103 = vmatpush.msrb.mxu3 %v422_v3  ;;  %v354_v14 = vld [vmem:[%s2713_s14 + $0x238] sm:$0xff] }
  0x3f   : > { %860 = vmatmul.f32.gmra.mxu3 %v293_v15  ;;  %910 = vmatpush.msrb.mxu0 %v545_v16  ;;  %v2810_v32 = vld [vmem:[%s2713_s14 + $0xe0] sm:$0xff]  ;;  %v313_v33 = vld [vmem:[%s2713_s14 + $0xf0] sm:$0xff]  ;;  %v356_v15 = vld [vmem:[%s2713_s14 + $0x248] sm:$0xff] }
  0x40   : > { %975 = vmatpush.msrb.mxu1 %v577_v17  ;;  %v537_v36 = vld [vmem:[%s4450_s1 + $0x470] sm:$0xff]  ;;  %v319_v40 = vld [vmem:[%s2713_s14 + $0x120] sm:$0xff]  ;;  %1104 = vmatpush.msrb.mxu3 %v420_v7  ;;  %v414_v17 = vld [vmem:[%s4450_s1 + $0x98] sm:$0xff] }
  0x41   : > { %911 = vmatpush.msrb.mxu0 %v543_v18  ;;  %v569_v37 = vld [vmem:[%s4450_s1 + $0x570] sm:$0xff]  ;;  %v535_v42 = vld [vmem:[%s4450_s1 + $0x460] sm:$0xff]  ;;  %v412_v18 = vld [vmem:[%s4450_s1 + $0x88] sm:$0xff] }
  0x42   : > { %976 = vmatpush.msrb.mxu1 %v575_v19  ;;  %v321_v41 = vld [vmem:[%s2713_s14 + $0x130] sm:$0xff]  ;;  %v567_v43 = vld [vmem:[%s4450_s1 + $0x560] sm:$0xff]  ;;  %1105 = vmatpush.msrb.mxu3 %v418_v9 }
  0x43   : > { %912 = vmatpush.msrb.mxu0 %v541_v24  ;;  %v2836_v44 = vld [vmem:[%s2713_s14 + $0x150] sm:$0xff]  ;;  %v327_v45 = vld [vmem:[%s2713_s14 + $0x160] sm:$0xff]  ;;  %v410_v24 = vld [vmem:[%s4450_s1 + $0x78] sm:$0xff] }
  0x44   : > { %668 = vmatmul.f32.gmra.mxu0 %v2784_v20  ;;  %798 = vmatmul.f32.gmra.mxu2 %v299_v21  ;;  %v533_v48 = vld [vmem:[%s4450_s1 + $0x450] sm:$0xff]  ;;  %v335_v53 = vld [vmem:[%s2713_s14 + $0x1a0] sm:$0xff] }
  0x45   : > { %977 = vmatpush.msrb.mxu1 %v573_v25  ;;  %913 = vmatpush.msrb.mxu0 %v539_v30  ;;  %v565_v49 = vld [vmem:[%s4450_s1 + $0x550] sm:$0xff]  ;;  %v531_v54 = vld [vmem:[%s4450_s1 + $0x440] sm:$0xff]  ;;  %v406_v30 = vld [vmem:[%s4450_s1 + $0x58] sm:$0xff] }
  0x46   : > { %733 = vmatmul.f32.gmra.mxu1 %v298_v22  ;;  %v333_v52 = vld [vmem:[%s2713_s14 + $0x190] sm:$0xff]  ;;  %v563_v55 = vld [vmem:[%s4450_s1 + $0x540] sm:$0xff]  ;;  %1106 = vmatpush.msrb.mxu3 %v416_v13  ;;  %v2928_v22 = vld [vmem:[%s2713_s14 + $0x268] sm:$0xff] }
  0x47   : > { %863 = vmatmul.f32.gmra.mxu3 %v300_v23  ;;  %978 = vmatpush.msrb.mxu1 %v571_v31  ;;  %v2862_v56 = vld [vmem:[%s2713_s14 + $0x1c0] sm:$0xff]  ;;  %v341_v57 = vld [vmem:[%s2713_s14 + $0x1d0] sm:$0xff]  ;;  %v362_v23 = vld [vmem:[%s2713_s14 + $0x278] sm:$0xff] }
  0x48   : > { %914 = vmatpush.msrb.mxu0 %v537_v36  ;;  %v529_v60 = vld [vmem:[%s4450_s1 + $0x430] sm:$0xff]  ;;  %v347_v4 = vld [vmem:[%s2713_s14 + $0x200] sm:$0xff]  ;;  %1107 = vmatpush.msrb.mxu3 %v414_v17  ;;  %v368_v36 = vld [vmem:[%s2713_s14 + $0x2a8] sm:$0xff] }
  0x49   : > { %979 = vmatpush.msrb.mxu1 %v569_v37  ;;  %v561_v61 = vld [vmem:[%s4450_s1 + $0x530] sm:$0xff]  ;;  %v527_v6 = vld [vmem:[%s4450_s1 + $0x420] sm:$0xff] }
  0x4a   : > { %915 = vmatpush.msrb.mxu0 %v535_v42  ;;  %v349_v5 = vld [vmem:[%s2713_s14 + $0x210] sm:$0xff]  ;;  %v559_v8 = vld [vmem:[%s4450_s1 + $0x520] sm:$0xff]  ;;  %1108 = vmatpush.msrb.mxu3 %v412_v18  ;;  %v400_v42 = vld [vmem:[%s4450_s1 + $0x28] sm:$0xff] }
  0x4b   : > { %980 = vmatpush.msrb.mxu1 %v567_v43  ;;  %v2903_v11 = vld [vmem:[%s2713_s14 + $0x230] sm:$0xff]  ;;  %v355_v12 = vld [vmem:[%s2713_s14 + $0x240] sm:$0xff]  ;;  %v490_v43 = vld [vmem:[%s4450_s1 + $0x2f8] sm:$0xff] }
  0x4c   : > { %671 = vmatmul.f32.gmra.mxu0 %v2797_v26  ;;  %801 = vmatmul.f32.gmra.mxu2 %v306_v27  ;;  %v525_v16 = vld [vmem:[%s4450_s1 + $0x410] sm:$0xff]  ;;  %v363_v27 = vld [vmem:[%s2713_s14 + $0x280] sm:$0xff]  ;;  %v482_v18 = vld [vmem:[%s4450_s1 + $0x2b8] sm:$0xff] }
  0x4d   : > { %916 = vmatpush.msrb.mxu0 %v533_v48  ;;  %981 = vmatpush.msrb.mxu1 %v565_v49  ;;  %v557_v19 = vld [vmem:[%s4450_s1 + $0x510] sm:$0xff]  ;;  %v555_v31 = vld [vmem:[%s4450_s1 + $0x500] sm:$0xff] }
  0x4e   : > { %736 = vmatmul.f32.gmra.mxu1 %v305_v28  ;;  %v589_v21 = vld [vmem:[%s4450_s1 + $0x610] sm:$0xff]  ;;  %v523_v28 = vld [vmem:[%s4450_s1 + $0x400] sm:$0xff]  ;;  %1109 = vmatpush.msrb.mxu3 %v410_v24  ;;  %v296_v24 = vld [vmem:[%s2713_s14 + $0x68] sm:$0xff] }
  0x4f   : > { %866 = vmatmul.f32.gmra.mxu3 %v307_v29  ;;  %917 = vmatpush.msrb.mxu0 %v531_v54  ;;  %v361_v25 = vld [vmem:[%s2713_s14 + $0x270] sm:$0xff]  ;;  %v408_v29 = vld [vmem:[%s4450_s1 + $0x68] sm:$0xff]  ;;  %v587_v37 = vld [vmem:[%s4450_s1 + $0x600] sm:$0xff] }
  0x50   : > { %982 = vmatpush.msrb.mxu1 %v563_v55  ;;  %1050 = vmatpush.msrb.mxu2 %v589_v21  ;;  %v375_v48 = vld [vmem:[%s2713_s14 + $0x2e0] sm:$0xff]  ;;  %v377_v49 = vld [vmem:[%s2713_s14 + $0x2f0] sm:$0xff] }
  0x51   : > { %918 = vmatpush.msrb.mxu0 %v529_v60  ;;  %1110 = vmatpush.msrb.mxu3 %v408_v29  ;;  %v2994_v54 = vld [vmem:[%s2713_s14 + $0x310] sm:$0xff]  ;;  %v383_v55 = vld [vmem:[%s2713_s14 + $0x320] sm:$0xff]  ;;  %v486_v60 = vld [vmem:[%s4450_s1 + $0x2d8] sm:$0xff] }
  0x52   : > { %983 = vmatpush.msrb.mxu1 %v561_v61  ;;  %1051 = vmatpush.msrb.mxu2 %v587_v37  ;;  %v3007_v61 = vld [vmem:[%s2713_s14 + $0x348] sm:$0xff]  ;;  %v389_v0 = vld [vmem:[%s2713_s14 + $0x350] sm:$0xff]  ;;  %v391_v3 = vld [vmem:[%s2713_s14 + $0x360] sm:$0xff] }
  0x53   : > { %919 = vmatpush.msrb.mxu0 %v527_v6  ;;  %1111 = vmatpush.msrb.mxu3 %v406_v30  ;;  %v484_v6 = vld [vmem:[%s4450_s1 + $0x2c8] sm:$0xff]  ;;  %v289_v9 = vld [vmem:[%s2713_s14 + $0x30] sm:$0xff] }
  0x54   : > { %674 = vmatmul.f32.gmra.mxu0 %v2810_v32  ;;  %804 = vmatmul.f32.gmra.mxu2 %v313_v33  ;;  %v2950_v33 = vld [vmem:[%s2713_s14 + $0x2a0] sm:$0xff]  ;;  %v448_v30 = vld [vmem:[%s4450_s1 + $0x1a8] sm:$0xff] }
  0x55   : > { %984 = vmatpush.msrb.mxu1 %v559_v8  ;;  %920 = vmatpush.msrb.mxu0 %v525_v16  ;;  %v3025_v8 = vld [vmem:[%s2713_s14 + $0x20] sm:$0xff] }
  0x56   : > { %739 = vmatmul.f32.gmra.mxu1 %v312_v34  ;;  %v369_v34 = vld [vmem:[%s2713_s14 + $0x2b0] sm:$0xff] }
  0x57   : > { %869 = vmatmul.f32.gmra.mxu3 %v314_v35  ;;  %985 = vmatpush.msrb.mxu1 %v557_v19  ;;  %v404_v35 = vld [vmem:[%s4450_s1 + $0x48] sm:$0xff] }
  0x58   : > { %921 = vmatpush.msrb.mxu0 %v523_v28  ;;  %1112 = vmatpush.msrb.mxu3 %v404_v35  ;;  %v480_v35 = vld [vmem:[%s4450_s1 + $0x2a8] sm:$0xff] }
  0x59   : > { %986 = vmatpush.msrb.mxu1 %v555_v31 }
  0x5b   : > { %1231 = vmatpush.msra.mxu1 %v490_v43 }
  0x5c   : > { %677 = vmatmul.f32.gmra.mxu0 %v2823_v38  ;;  %807 = vmatmul.f32.gmra.mxu2 %v320_v39  ;;  %v370_v39 = vld [vmem:[%s2713_s14 + $0x2b8] sm:$0xff] }
  0x5e   : > { %742 = vmatmul.f32.gmra.mxu1 %v319_v40  ;;  %v458_v40 = vld [vmem:[%s4450_s1 + $0x1f8] sm:$0xff] }
  0x5f   : > { %872 = vmatmul.f32.gmra.mxu3 %v321_v41  ;;  %v402_v41 = vld [vmem:[%s4450_s1 + $0x38] sm:$0xff]  ;;  %1166 = vmatpush.msra.mxu0 %v458_v40  ;;  %v303_v40 = vld [vmem:[%s2713_s14 + $0xa0] sm:$0xff] }
  0x60   : > { %1113 = vmatpush.msrb.mxu3 %v402_v41 }
  0x62   : > { %1114 = vmatpush.msrb.mxu3 %v400_v42 }
  0x64   : > { %680 = vmatmul.f32.gmra.mxu0 %v2836_v44  ;;  %810 = vmatmul.f32.gmra.mxu2 %v327_v45  ;;  %v2975_v45 = vld [vmem:[%s2713_s14 + $0x2d8] sm:$0xff] }
  0x66   : > { %745 = vmatmul.f32.gmra.mxu1 %v326_v46  ;;  %v376_v46 = vld [vmem:[%s2713_s14 + $0x2e8] sm:$0xff] }
  0x67   : > { %875 = vmatmul.f32.gmra.mxu3 %v328_v47  ;;  %v398_v47 = vld [vmem:[%s4450_s1 + $0x18] sm:$0xff] }
  0x68   : > { %1115 = vmatpush.msrb.mxu3 %v398_v47  ;;  %v446_v47 = vld [vmem:[%s4450_s1 + $0x198] sm:$0xff] }
  0x6c   : > { %683 = vmatmul.f32.gmra.mxu0 %v2849_v50  ;;  %813 = vmatmul.f32.gmra.mxu2 %v334_v51  ;;  %v456_v51 = vld [vmem:[%s4450_s1 + $0x1e8] sm:$0xff] }
  0x6d   : > { %1167 = vmatpush.msra.mxu0 %v456_v51  ;;  %v478_v51 = vld [vmem:[%s4450_s1 + $0x298] sm:$0xff] }
  0x6e   : > { %748 = vmatmul.f32.gmra.mxu1 %v333_v52  ;;  %v396_v52 = vld [vmem:[%s4450_s1 + $0x8] sm:$0xff] }
  0x6f   : > { %878 = vmatmul.f32.gmra.mxu3 %v335_v53  ;;  %v488_v53 = vld [vmem:[%s4450_s1 + $0x2e8] sm:$0xff] }
  0x70   : > { %1116 = vmatpush.msrb.mxu3 %v396_v52  ;;  %1232 = vmatpush.msra.mxu1 %v488_v53 }
  0x72   : > { %1233 = vmatpush.msra.mxu1 %v486_v60 }
  0x74   : > { %686 = vmatmul.f32.gmra.mxu0 %v2862_v56  ;;  %816 = vmatmul.f32.gmra.mxu2 %v341_v57  ;;  %v382_v57 = vld [vmem:[%s2713_s14 + $0x318] sm:$0xff] }
  0x75   : > { %1234 = vmatpush.msra.mxu1 %v484_v6 }
  0x76   : > { %751 = vmatmul.f32.gmra.mxu1 %v340_v58  ;;  %v384_v58 = vld [vmem:[%s2713_s14 + $0x328] sm:$0xff] }
  0x77   : > { %881 = vmatmul.f32.gmra.mxu3 %v342_v59  ;;  %v454_v59 = vld [vmem:[%s4450_s1 + $0x1d8] sm:$0xff]  ;;  %1235 = vmatpush.msra.mxu1 %v482_v18 }
  0x78   : > { %1168 = vmatpush.msra.mxu0 %v454_v59 }
  0x79   : > { %1236 = vmatpush.msra.mxu1 %v480_v35  ;;  %v440_v35 = vld [vmem:[%s4450_s1 + $0x168] sm:$0xff] }
  0x7b   : > { %1237 = vmatpush.msra.mxu1 %v478_v51 }
  0x7c   : > { %689 = vmatmul.f32.gmra.mxu0 %v2881_v1  ;;  %819 = vmatmul.f32.gmra.mxu2 %v348_v2  ;;  %v591_v2 = vld [vmem:[%s4451_s2] sm:$0x3] }
  0x7e   : > { %754 = vmatmul.f32.gmra.mxu1 %v347_v4  ;;  %v452_v4 = vld [vmem:[%s4450_s1 + $0x1c8] sm:$0xff] }
  0x7f   : > { %884 = vmatmul.f32.gmra.mxu3 %v349_v5  ;;  %1169 = vmatpush.msra.mxu0 %v452_v4  ;;  %v3019_v5 = vperm.slane %v591_v2, 0  ;;  %v476_v4 = vld [vmem:[%s4450_s1 + $0x288] sm:$0xff] }
  0x80   : > { %1238 = vmatpush.msra.mxu1 %v476_v4 }
  0x84   : > { %692 = vmatmul.f32.gmra.mxu0 %v2903_v11  ;;  %822 = vmatmul.f32.gmra.mxu2 %v355_v12 }
  0x86   : > { %757 = vmatmul.f32.gmra.mxu1 %v354_v14  ;;  %v288_v14 = vld [vmem:[%s2713_s14 + $0x28] sm:$0xff] }
  0x87   : > { %887 = vmatmul.f32.gmra.mxu3 %v356_v15  ;;  %v450_v15 = vld [vmem:[%s4450_s1 + $0x1b8] sm:$0xff] }
  0x88   : > { %1170 = vmatpush.msra.mxu0 %v450_v15 }
  0x8a   : > { %1171 = vmatpush.msra.mxu0 %v448_v30 }
  0x8c   : > { %695 = vmatmul.f32.gmra.mxu0 %v2928_v22  ;;  %825 = vmatmul.f32.gmra.mxu2 %v362_v23  ;;  %v3040_v23 = vld [vmem:[%s2713_s14 + $0x58] sm:$0xff] }
  0x8d   : > { %1172 = vmatpush.msra.mxu0 %v446_v47 }
  0x8e   : > { %760 = vmatmul.f32.gmra.mxu1 %v361_v25 }
  0x8f   : > { %890 = vmatmul.f32.gmra.mxu3 %v363_v27 }
  0x94   : > { %698 = vmatmul.f32.gmra.mxu0 %v2950_v33  ;;  %828 = vmatmul.f32.gmra.mxu2 %v369_v34 }
  0x96   : > { %763 = vmatmul.f32.gmra.mxu1 %v368_v36 }
  0x97   : > { %893 = vmatmul.f32.gmra.mxu3 %v370_v39  ;;  %v3057_v39 = vld [vmem:[%s2713_s14 + $0x90] sm:$0xff] }
  0x9c   : > { %701 = vmatmul.f32.gmra.mxu0 %v2975_v45  ;;  %831 = vmatmul.f32.gmra.mxu2 %v376_v46 }
  0x9e   : > { %766 = vmatmul.f32.gmra.mxu1 %v375_v48 }
  0x9f   : > { %896 = vmatmul.f32.gmra.mxu3 %v377_v49 }
  0xa4   : > { %704 = vmatmul.f32.gmra.mxu0 %v2994_v54  ;;  %834 = vmatmul.f32.gmra.mxu2 %v383_v55  ;;  %v3074_v55 = vld [vmem:[%s2713_s14 + $0xc8] sm:$0xff] }
  0xa6   : > { %769 = vmatmul.f32.gmra.mxu1 %v382_v57  ;;  %v310_v57 = vld [vmem:[%s2713_s14 + $0xd8] sm:$0xff] }
  0xa7   : > { %899 = vmatmul.f32.gmra.mxu3 %v384_v58 }
  0xac   : > { %707 = vmatmul.f32.gmra.mxu0 %v3007_v61  ;;  %837 = vmatmul.f32.gmra.mxu2 %v390_v63 }
  0xae   : > { %772 = vmatmul.f32.gmra.mxu1 %v389_v0  ;;  %v444_v0 = vld [vmem:[%s4450_s1 + $0x188] sm:$0xff] }
  0xaf   : > { %902 = vmatmul.f32.gmra.mxu3 %v391_v3  ;;  %1173 = vmatpush.msra.mxu0 %v444_v0  ;;  %v338_v0 = vld [vmem:[%s2713_s14 + $0x1b8] sm:$0xff] }
  0xb1   : > { %v663_v7 = vpop.f32.mrf.mxu0 }
  0xb2   : > { %v664_v12 = vadd.f32 %v663_v7, %v3019_v5 }
  0xb3   : > { %v728_v13 = vpop.f32.mrf.mxu1 }
  0xb4   : > { %922 = vmatmul.f32.vlgmr.msrb.gmra.mxu0 %v3025_v8  ;;  %2217 = vmatmul.msk.f32.vlgmr.msrb.gmra.mxu2 %vm597_vm0, %v289_v9  ;;  %v729_v16 = vadd.f32 %v728_v13, %v664_v12  ;;  %v3091_v9 = vld [vmem:[%s2713_s14 + $0x100] sm:$0xff]  ;;  %v317_v12 = vld [vmem:[%s2713_s14 + $0x110] sm:$0xff] }
  0xb6   : > { %987 = vmatmul.f32.vlgmr.msrb.gmra.mxu1 %v288_v14 }
  0xb7   : > { %1117 = vmatmul.f32.vlgmr.msrb.gmra.mxu3 %v2728_v62  ;;  %v793_v17 = vpop.f32.mrf.mxu2  ;;  %v295_v62 = vld [vmem:[%s2713_s14 + $0x60] sm:$0xff] }
  0xb8   : > { %v794_v19 = vadd.f32 %v793_v17, %v729_v16  ;;  %v442_v17 = vld [vmem:[%s4450_s1 + $0x178] sm:$0xff] }
  0xb9   : > { %v666_v21 = vpop.f32.mrf.mxu0  ;;  %1174 = vmatpush.msra.mxu0 %v442_v17  ;;  %v3159_v17 = vld [vmem:[%s2713_s14 + $0x1e0] sm:$0xff] }
  0xba   : > { %v667_v25 = vadd.f32 %v666_v21, %v3019_v5  ;;  %v858_v27 = vpop.f32.mrf.mxu3  ;;  %v474_v21 = vld [vmem:[%s4450_s1 + $0x278] sm:$0xff] }
  0xbb   : > { %v3044_v28 = vadd.f32 %v858_v27, %v794_v19  ;;  %v731_v29 = vpop.f32.mrf.mxu1  ;;  %1239 = vmatpush.msra.mxu1 %v474_v21  ;;  %v3108_v27 = vld [vmem:[%s2713_s14 + $0x138] sm:$0xff]  ;;  %1175 = vmatpush.msra.mxu0 %v440_v35  ;;  %v520_v35 = vld [vmem:[%s4450_s1 + $0x3e8] sm:$0xff] }
  0xbc   : > { %925 = vmatmul.f32.gmra.mxu0 %v3040_v23  ;;  %2218 = vmatmul.msk.f32.gmra.mxu2 %vm597_vm0, %v296_v24  ;;  %v732_v31 = vadd.f32 %v731_v29, %v667_v25  ;;  %v324_v29 = vld [vmem:[%s2713_s14 + $0x148] sm:$0xff] }
  0xbe   : > { %990 = vmatmul.f32.gmra.mxu1 %v295_v62 }
  0xbf   : > { %1120 = vmatmul.f32.gmra.mxu3 %v2759_v10  ;;  %v796_v34 = vpop.f32.mrf.mxu2  ;;  %v302_v10 = vld [vmem:[%s2713_s14 + $0x98] sm:$0xff] }
  0xc0   : > { %v797_v36 = vadd.f32 %v796_v34, %v732_v31 }
  0xc1   : > { %v669_v37 = vpop.f32.mrf.mxu0 }
  0xc2   : > { %v670_v41 = vadd.f32 %v669_v37, %v3019_v5  ;;  %v861_v42 = vpop.f32.mrf.mxu3 }
  0xc3   : > { %v3061_v43 = vadd.f32 %v861_v42, %v797_v36  ;;  %v734_v46 = vpop.f32.mrf.mxu1 }
  0xc4   : > { %928 = vmatmul.f32.gmra.mxu0 %v3057_v39  ;;  %2219 = vmatmul.msk.f32.gmra.mxu2 %vm597_vm0, %v303_v40  ;;  %v735_v48 = vadd.f32 %v734_v46, %v670_v41  ;;  %v472_v40 = vld [vmem:[%s4450_s1 + $0x268] sm:$0xff]  ;;  %v3125_v46 = vld [vmem:[%s2713_s14 + $0x170] sm:$0xff] }
  0xc5   : > { %1240 = vmatpush.msra.mxu1 %v472_v40  ;;  %v3185_v40 = vld [vmem:[%s2713_s14 + $0x218] sm:$0xff] }
  0xc6   : > { %993 = vmatmul.f32.gmra.mxu1 %v302_v10  ;;  %v331_v10 = vld [vmem:[%s2713_s14 + $0x180] sm:$0xff] }
  0xc7   : > { %1123 = vmatmul.f32.gmra.mxu3 %v2784_v20  ;;  %v799_v49 = vpop.f32.mrf.mxu2  ;;  %v309_v20 = vld [vmem:[%s2713_s14 + $0xd0] sm:$0xff] }
  0xc8   : > { %v800_v52 = vadd.f32 %v799_v49, %v735_v48 }
  0xc9   : > { %v672_v53 = vpop.f32.mrf.mxu0 }
  0xca   : > { %v673_v58 = vadd.f32 %v672_v53, %v3019_v5  ;;  %v864_v59 = vpop.f32.mrf.mxu3 }
  0xcb   : > { %v3078_v60 = vadd.f32 %v864_v59, %v800_v52  ;;  %v737_v63 = vpop.f32.mrf.mxu1  ;;  %v438_v52 = vld [vmem:[%s4450_s1 + $0x158] sm:$0xff] }
  0xcc   : > { %931 = vmatmul.f32.gmra.mxu0 %v3074_v55  ;;  %2220 = vmatmul.msk.f32.gmra.mxu2 %vm597_vm0, %v310_v57  ;;  %v738_v2 = vadd.f32 %v737_v63, %v673_v58  ;;  %v470_v58 = vld [vmem:[%s4450_s1 + $0x258] sm:$0xff] }
  0xcd   : > { %1176 = vmatpush.msra.mxu0 %v438_v52  ;;  %1241 = vmatpush.msra.mxu1 %v470_v58  ;;  %v351_v52 = vld [vmem:[%s2713_s14 + $0x220] sm:$0xff]  ;;  %v432_v58 = vld [vmem:[%s4450_s1 + $0x128] sm:$0xff] }
  0xce   : > { %996 = vmatmul.f32.gmra.mxu1 %v309_v20  ;;  %v3142_v20 = vld [vmem:[%s2713_s14 + $0x1a8] sm:$0xff] }
  0xcf   : > { %1126 = vmatmul.f32.gmra.mxu3 %v2797_v26  ;;  %v802_v3 = vpop.f32.mrf.mxu2  ;;  %v316_v26 = vld [vmem:[%s2713_s14 + $0x108] sm:$0xff] }
  0xd0   : > { %v803_v6 = vadd.f32 %v802_v3, %v738_v2 }
  0xd1   : > { %v675_v7 = vpop.f32.mrf.mxu0 }
  0xd2   : > { %v676_v13 = vadd.f32 %v675_v7, %v3019_v5  ;;  %v867_v14 = vpop.f32.mrf.mxu3  ;;  %v436_v7 = vld [vmem:[%s4450_s1 + $0x148] sm:$0xff] }
  0xd3   : > { %v3095_v15 = vadd.f32 %v867_v14, %v803_v6  ;;  %v740_v16 = vpop.f32.mrf.mxu1  ;;  %1177 = vmatpush.msra.mxu0 %v436_v7  ;;  %v468_v14 = vld [vmem:[%s4450_s1 + $0x248] sm:$0xff] }
  0xd4   : > { %934 = vmatmul.f32.gmra.mxu0 %v3091_v9  ;;  %2221 = vmatmul.msk.f32.gmra.mxu2 %vm597_vm0, %v317_v12  ;;  %v741_v18 = vadd.f32 %v740_v16, %v676_v13 }
  0xd5   : > { %1242 = vmatpush.msra.mxu1 %v468_v14  ;;  %v510_v14 = vld [vmem:[%s4450_s1 + $0x398] sm:$0xff] }
  0xd6   : > { %999 = vmatmul.f32.gmra.mxu1 %v316_v26 }
  0xd7   : > { %1129 = vmatmul.f32.gmra.mxu3 %v2810_v32  ;;  %v805_v19 = vpop.f32.mrf.mxu2  ;;  %v323_v32 = vld [vmem:[%s2713_s14 + $0x140] sm:$0xff] }
  0xd8   : > { %v806_v24 = vadd.f32 %v805_v19, %v741_v18  ;;  %v345_v18 = vld [vmem:[%s2713_s14 + $0x1f0] sm:$0xff] }
  0xd9   : > { %v678_v25 = vpop.f32.mrf.mxu0 }
  0xda   : > { %v679_v62 = vadd.f32 %v678_v25, %v3019_v5  ;;  %v870_v30 = vpop.f32.mrf.mxu3 }
  0xdb   : > { %v3112_v31 = vadd.f32 %v870_v30, %v806_v24  ;;  %v743_v34 = vpop.f32.mrf.mxu1 }
  0xdc   : > { %937 = vmatmul.f32.gmra.mxu0 %v3108_v27  ;;  %2222 = vmatmul.msk.f32.gmra.mxu2 %vm597_vm0, %v324_v29  ;;  %v744_v36 = vadd.f32 %v743_v34, %v679_v62  ;;  %v344_v29 = vld [vmem:[%s2713_s14 + $0x1e8] sm:$0xff]  ;;  %v522_v62 = vld [vmem:[%s4450_s1 + $0x3f8] sm:$0xff] }
  0xdd   : > { %1296 = vmatpush.msra.mxu2 %v522_v62  ;;  %v542_v62 = vld [vmem:[%s4450_s1 + $0x498] sm:$0xff] }
  0xde   : > { %1002 = vmatmul.f32.gmra.mxu1 %v323_v32  ;;  %v466_v32 = vld [vmem:[%s4450_s1 + $0x238] sm:$0xff] }
  0xdf   : > { %1132 = vmatmul.f32.gmra.mxu3 %v2823_v38  ;;  %v808_v37 = vpop.f32.mrf.mxu2  ;;  %v330_v38 = vld [vmem:[%s2713_s14 + $0x178] sm:$0xff]  ;;  %1243 = vmatpush.msra.mxu1 %v466_v32 }
  0xe0   : > { %v809_v41 = vadd.f32 %v808_v37, %v744_v36  ;;  %v554_v36 = vld [vmem:[%s4450_s1 + $0x4f8] sm:$0xff]  ;;  %1297 = vmatpush.msra.mxu2 %v520_v35  ;;  %v540_v35 = vld [vmem:[%s4450_s1 + $0x488] sm:$0xff] }
  0xe1   : > { %v681_v42 = vpop.f32.mrf.mxu0  ;;  %1361 = vmatpush.msra.mxu3 %v554_v36  ;;  %v462_v36 = vld [vmem:[%s4450_s1 + $0x218] sm:$0xff] }
  0xe2   : > { %v682_v47 = vadd.f32 %v681_v42, %v3019_v5  ;;  %v873_v48 = vpop.f32.mrf.mxu3  ;;  %v518_v42 = vld [vmem:[%s4450_s1 + $0x3d8] sm:$0xff] }
  0xe3   : > { %v3129_v49 = vadd.f32 %v873_v48, %v809_v41  ;;  %v746_v51 = vpop.f32.mrf.mxu1  ;;  %v352_v41 = vld [vmem:[%s2713_s14 + $0x228] sm:$0xff]  ;;  %1298 = vmatpush.msra.mxu2 %v518_v42  ;;  %v3270_v42 = vld [vmem:[%s2713_s14 + $0x298] sm:$0xff] }
  0xe4   : > { %940 = vmatmul.f32.gmra.mxu0 %v3125_v46  ;;  %2223 = vmatmul.msk.f32.gmra.mxu2 %vm597_vm0, %v331_v10  ;;  %v747_v53 = vadd.f32 %v746_v51, %v682_v47  ;;  %v552_v10 = vld [vmem:[%s4450_s1 + $0x4e8] sm:$0xff] }
  0xe5   : > { %1362 = vmatpush.msra.mxu3 %v552_v10  ;;  %v502_v10 = vld [vmem:[%s4450_s1 + $0x358] sm:$0xff] }
  0xe6   : > { %1005 = vmatmul.f32.gmra.mxu1 %v330_v38 }
  0xe7   : > { %1135 = vmatmul.f32.gmra.mxu3 %v2836_v44  ;;  %v811_v57 = vpop.f32.mrf.mxu2  ;;  %v337_v44 = vld [vmem:[%s2713_s14 + $0x1b0] sm:$0xff] }
  0xe8   : > { %v812_v59 = vadd.f32 %v811_v57, %v747_v53  ;;  %v516_v53 = vld [vmem:[%s4450_s1 + $0x3c8] sm:$0xff]  ;;  %v550_v57 = vld [vmem:[%s4450_s1 + $0x4d8] sm:$0xff] }
  0xe9   : > { %v684_v63 = vpop.f32.mrf.mxu0  ;;  %1299 = vmatpush.msra.mxu2 %v516_v53  ;;  %1363 = vmatpush.msra.mxu3 %v550_v57  ;;  %v3282_v57 = vld [vmem:[%s2713_s14 + $0x290] sm:$0xff] }
  0xea   : > { %v685_v2 = vadd.f32 %v684_v63, %v3019_v5  ;;  %v876_v3 = vpop.f32.mrf.mxu3  ;;  %v548_v63 = vld [vmem:[%s4450_s1 + $0x4c8] sm:$0xff] }
  0xeb   : > { %v3146_v4 = vadd.f32 %v876_v3, %v812_v59  ;;  %v749_v6 = vpop.f32.mrf.mxu1  ;;  %v514_v59 = vld [vmem:[%s4450_s1 + $0x3b8] sm:$0xff]  ;;  %v464_v3 = vld [vmem:[%s4450_s1 + $0x228] sm:$0xff]  ;;  %1364 = vmatpush.msra.mxu3 %v548_v63 }
  0xec   : > { %943 = vmatmul.f32.gmra.mxu0 %v3142_v20  ;;  %2224 = vmatmul.msk.f32.gmra.mxu2 %vm597_vm0, %v338_v0  ;;  %v750_v12 = vadd.f32 %v749_v6, %v685_v2  ;;  %v512_v6 = vld [vmem:[%s4450_s1 + $0x3a8] sm:$0xff] }
  0xed   : > { %1300 = vmatpush.msra.mxu2 %v514_v59  ;;  %1244 = vmatpush.msra.mxu1 %v464_v3  ;;  %v428_v59 = vld [vmem:[%s4450_s1 + $0x108] sm:$0xff] }
  0xee   : > { %1008 = vmatmul.f32.gmra.mxu1 %v337_v44  ;;  %v546_v44 = vld [vmem:[%s4450_s1 + $0x4b8] sm:$0xff]  ;;  %v536_v63 = vld [vmem:[%s4450_s1 + $0x468] sm:$0xff] }
  0xef   : > { %1138 = vmatmul.f32.gmra.mxu3 %v2849_v50  ;;  %v814_v13 = vpop.f32.mrf.mxu2  ;;  %v434_v50 = vld [vmem:[%s4450_s1 + $0x138] sm:$0xff]  ;;  %1301 = vmatpush.msra.mxu2 %v512_v6 }
  0xf0   : > { %v815_v16 = vadd.f32 %v814_v13, %v750_v12  ;;  %1178 = vmatpush.msra.mxu0 %v434_v50  ;;  %v359_v13 = vld [vmem:[%s2713_s14 + $0x260] sm:$0xff]  ;;  %1365 = vmatpush.msra.mxu3 %v546_v44  ;;  %v430_v50 = vld [vmem:[%s4450_s1 + $0x118] sm:$0xff]  ;;  %v460_v44 = vld [vmem:[%s4450_s1 + $0x208] sm:$0xff] }
  0xf1   : > { %v687_v26 = vpop.f32.mrf.mxu0  ;;  %1302 = vmatpush.msra.mxu2 %v510_v14  ;;  %1245 = vmatpush.msra.mxu1 %v462_v36  ;;  %v534_v6 = vld [vmem:[%s4450_s1 + $0x458] sm:$0xff]  ;;  %v3314_v14 = vld [vmem:[%s2713_s14 + $0x2d0] sm:$0xff] }
  0xf2   : > { %v688_v19 = vadd.f32 %v687_v26, %v3019_v5  ;;  %v879_v21 = vpop.f32.mrf.mxu3  ;;  %1179 = vmatpush.msra.mxu0 %v432_v58  ;;  %v500_v58 = vld [vmem:[%s4450_s1 + $0x348] sm:$0xff]  ;;  %4489 = vst [vmem:[#allocation5_spill] sm:$0xff] %v3314_v14 }
  0xf3   : > { %v3163_v24 = vadd.f32 %v879_v21, %v815_v16  ;;  %v752_v25 = vpop.f32.mrf.mxu1  ;;  %1246 = vmatpush.msra.mxu1 %v460_v44 }
  0xf4   : > { %946 = vmatmul.f32.gmra.mxu0 %v3159_v17  ;;  %2225 = vmatmul.msk.f32.gmra.mxu2 %vm597_vm0, %v345_v18  ;;  %v753_v30 = vadd.f32 %v752_v25, %v688_v19  ;;  %v544_v18 = vld [vmem:[%s4450_s1 + $0x4a8] sm:$0xff]  ;;  %v3239_v25 = vld [vmem:[%s2713_s14 + $0x258] sm:$0xff] }
  0xf5   : > { %1366 = vmatpush.msra.mxu3 %v544_v18  ;;  %1180 = vmatpush.msra.mxu0 %v430_v50 }
  0xf6   : > { %1011 = vmatmul.f32.gmra.mxu1 %v344_v29  ;;  %v508_v29 = vld [vmem:[%s4450_s1 + $0x388] sm:$0xff] }
  0xf7   : > { %1141 = vmatmul.f32.gmra.mxu3 %v2862_v56  ;;  %v817_v34 = vpop.f32.mrf.mxu2  ;;  %1303 = vmatpush.msra.mxu2 %v508_v29 }
  0xf8   : > { %v818_v37 = vadd.f32 %v817_v34, %v753_v30  ;;  %v506_v30 = vld [vmem:[%s4450_s1 + $0x378] sm:$0xff]  ;;  %1367 = vmatpush.msra.mxu3 %v542_v62  ;;  %1181 = vmatpush.msra.mxu0 %v428_v59  ;;  %v3326_v62 = vld [vmem:[%s2713_s14 + $0x2c8] sm:$0xff] }
  0xf9   : > { %v690_v56 = vpop.f32.mrf.mxu0  ;;  %1304 = vmatpush.msra.mxu2 %v506_v30  ;;  %4490 = vst [vmem:[#allocation6_spill] sm:$0xff] %v3326_v62  ;;  %v492_v30 = vld [vmem:[%s4450_s1 + $0x308] sm:$0xff] }
  0xfa   : > { %v691_v47 = vadd.f32 %v690_v56, %v3019_v5  ;;  %v882_v48 = vpop.f32.mrf.mxu3  ;;  %1368 = vmatpush.msra.mxu3 %v540_v35 }
  0xfb   : > { %v3195_v51 = vadd.f32 %v882_v48, %v818_v37  ;;  %v755_v38 = vpop.f32.mrf.mxu1  ;;  %v504_v37 = vld [vmem:[%s4450_s1 + $0x368] sm:$0xff] }
  0xfc   : > { %949 = vmatmul.f32.gmra.mxu0 %v3185_v40  ;;  %2226 = vmatmul.msk.f32.gmra.mxu2 %vm597_vm0, %v352_v41  ;;  %v756_v0 = vadd.f32 %v755_v38, %v691_v47  ;;  %v538_v38 = vld [vmem:[%s4450_s1 + $0x478] sm:$0xff] }
  0xfd   : > { %1305 = vmatpush.msra.mxu2 %v504_v37  ;;  %1369 = vmatpush.msra.mxu3 %v538_v38  ;;  %v528_v37 = vld [vmem:[%s4450_s1 + $0x428] sm:$0xff] }
  0xfe   : > { %1014 = vmatmul.f32.gmra.mxu1 %v351_v52 }
  0xff   : > { %1144 = vmatmul.f32.gmra.mxu3 %v2881_v1  ;;  %v820_v2 = vpop.f32.mrf.mxu2  ;;  %v3226_v1 = vld [vmem:[%s2713_s14 + $0x250] sm:$0xff]  ;;  %1306 = vmatpush.msra.mxu2 %v502_v10 }
 0x100   : > { %v821_v7 = vadd.f32 %v820_v2, %v756_v0  ;;  %v498_v0 = vld [vmem:[%s4450_s1 + $0x338] sm:$0xff]  ;;  %1370 = vmatpush.msra.mxu3 %v536_v63  ;;  %v3361_v63 = vld [vmem:[%s2713_s14 + $0x300] sm:$0xff] }
 0x101   : > { %v693_v12 = vpop.f32.mrf.mxu0  ;;  %1307 = vmatpush.msra.mxu2 %v500_v58  ;;  %4492 = vst [vmem:[#allocation8_spill] sm:$0xff] %v3361_v63 }
 0x102   : > { %v694_v16 = vadd.f32 %v693_v12, %v3019_v5  ;;  %v885_v26 = vpop.f32.mrf.mxu3  ;;  %1371 = vmatpush.msra.mxu3 %v534_v6 }
 0x103   : > { %v3236_v19 = vadd.f32 %v885_v26, %v821_v7  ;;  %v758_v21 = vpop.f32.mrf.mxu1  ;;  %1308 = vmatpush.msra.mxu2 %v498_v0  ;;  %v496_v7 = vld [vmem:[%s4450_s1 + $0x328] sm:$0xff] }
 0x104   : > { %952 = vmatmul.f32.gmra.mxu0 %v3226_v1  ;;  %2227 = vmatmul.msk.f32.gmra.mxu2 %vm597_vm0, %v359_v13  ;;  %v759_v34 = vadd.f32 %v758_v21, %v694_v16  ;;  %v494_v16 = vld [vmem:[%s4450_s1 + $0x318] sm:$0xff]  ;;  %v532_v21 = vld [vmem:[%s4450_s1 + $0x448] sm:$0xff] }
 0x105   : > { %1309 = vmatpush.msra.mxu2 %v496_v7  ;;  %1372 = vmatpush.msra.mxu3 %v532_v21  ;;  %v584_v0 = vld [vmem:[%s4450_s1 + $0x5e8] sm:$0xff] }
 0x106   : > { %1017 = vmatmul.f32.gmra.mxu1 %v3239_v25 }
 0x107   : > { %1147 = vmatmul.f32.gmra.mxu3 %v2903_v11  ;;  %v823_v32 = vpop.f32.mrf.mxu2  ;;  %v3267_v11 = vld [vmem:[%s2713_s14 + $0x288] sm:$0xff]  ;;  %1310 = vmatpush.msra.mxu2 %v494_v16 }
 0x108   : > { %v824_v56 = vadd.f32 %v823_v32, %v759_v34  ;;  %v586_v34 = vld [vmem:[%s4450_s1 + $0x5f8] sm:$0xff] }
 0x109   : > { %v696_v41 = vpop.f32.mrf.mxu0  ;;  %v530_v32 = vld [vmem:[%s4450_s1 + $0x438] sm:$0xff]  ;;  %1311 = vmatpush.msra.mxu2 %v492_v30  ;;  %1426 = vmatpush.msrb.mxu0 %v586_v34 }
 0x10a   : > { %v697_v47 = vadd.f32 %v696_v41, %v3019_v5  ;;  %v888_v48 = vpop.f32.mrf.mxu3  ;;  %1373 = vmatpush.msra.mxu3 %v530_v32 }
 0x10b   : > { %v3279_v52 = vadd.f32 %v888_v48, %v824_v56  ;;  %v761_v53 = vpop.f32.mrf.mxu1  ;;  %v590_v56 = vld [vmem:[%s4450_s1 + $0x618] sm:$0xff]  ;;  %v3352_v48 = vld [vmem:[%s2713_s14 + $0x308] sm:$0xff]  ;;  %1427 = vmatpush.msrb.mxu0 %v584_v0 }
 0x10c   : > { %955 = vmatmul.f32.gmra.mxu0 %v3267_v11  ;;  %2228 = vmatmul.msk.f32.gmra.mxu2 %vm597_vm0, %v3270_v42  ;;  %v762_v2 = vadd.f32 %v761_v53, %v697_v47  ;;  %v3349_v47 = vld [vmem:[%s2713_s14 + $0x2f8] sm:$0xff]  ;;  %4491 = vst [vmem:[#allocation7_spill] sm:$0xff] %v3352_v48 }
 0x10d   : > { %1505 = vmatpush.msrb.mxu1 %v590_v56  ;;  %1374 = vmatpush.msra.mxu3 %v528_v37  ;;  %v526_v53 = vld [vmem:[%s4450_s1 + $0x418] sm:$0xff] }
 0x10e   : > { %1020 = vmatmul.f32.gmra.mxu1 %v3282_v57  ;;  %v3398_v37 = vld [vmem:[%s2713_s14 + $0x378] sm:$0xff] }
 0x10f   : > { %1150 = vmatmul.f32.gmra.mxu3 %v2928_v22  ;;  %v826_v3 = vpop.f32.mrf.mxu2  ;;  %v3311_v22 = vld [vmem:[%s2713_s14 + $0x2c0] sm:$0xff]  ;;  %4495 = vst [vmem:[#allocation11_spill] sm:$0xff] %v3398_v37 }
 0x110   : > { %v827_v12 = vadd.f32 %v826_v3, %v762_v2  ;;  %1375 = vmatpush.msra.mxu3 %v526_v53  ;;  %v524_v2 = vld [vmem:[%s4450_s1 + $0x408] sm:$0xff] }
 0x111   : > { %v699_v13 = vpop.f32.mrf.mxu0 }
 0x112   : > { %v700_v26 = vadd.f32 %v699_v13, %v3019_v5  ;;  %v891_v18 = vpop.f32.mrf.mxu3  ;;  %1376 = vmatpush.msra.mxu3 %v524_v2  ;;  %v3378_v13 = vld [vmem:[%s2713_s14 + $0x340] sm:$0xff] }
 0x113   : > { %v3323_v29 = vadd.f32 %v891_v18, %v827_v12  ;;  %v764_v50 = vpop.f32.mrf.mxu1  ;;  %v3375_v12 = vld [vmem:[%s2713_s14 + $0x330] sm:$0xff]  ;;  %4493 = vst [vmem:[#allocation9_spill] sm:$0xff] %v3378_v13 }
 0x114   : > { %958 = vmatmul.f32.gmra.mxu0 %v3311_v22  ;;  %2229 = vmatmul.msk.f32.gmra.mxu2 %vm597_vm0, %v3314_v14  ;;  %v765_v35 = vadd.f32 %v764_v50, %v700_v26  ;;  %v3384_v50 = vld [vmem:[%s2713_s14 + $0x338] sm:$0xff] }
 0x115   : > { %4494 = vst [vmem:[#allocation10_spill] sm:$0xff] %v3384_v50 }
 0x116   : > { %1023 = vmatmul.f32.gmra.mxu1 %v3326_v62  ;;  %v2337_v62 = vld [vmem:[%s2713_s14 + $0x2e0] sm:$0xff] }
 0x117   : > { %1153 = vmatmul.f32.gmra.mxu3 %v2950_v33  ;;  %v829_v36 = vpop.f32.mrf.mxu2 }
 0x118   : > { %v830_v41 = vadd.f32 %v829_v36, %v765_v35  ;;  %v3395_v36 = vld [vmem:[%s2713_s14 + $0x368] sm:$0xff] }
 0x119   : > { %v702_v10 = vpop.f32.mrf.mxu0 }
 0x11a   : > { %v703_v33 = vadd.f32 %v702_v10, %v3019_v5  ;;  %v894_v38 = vpop.f32.mrf.mxu3 }
 0x11b   : > { %v3358_v58 = vadd.f32 %v894_v38, %v830_v41  ;;  %v767_v59 = vpop.f32.mrf.mxu1  ;;  %v3404_v38 = vld [vmem:[%s2713_s14 + $0x370] sm:$0xff] }
 0x11c   : > { %961 = vmatmul.f32.gmra.mxu0 %v3349_v47  ;;  %2230 = vmatmul.msk.f32.gmra.mxu2 %vm597_vm0, %v3352_v48  ;;  %v768_v3 = vadd.f32 %v767_v59, %v703_v33  ;;  %4497 = vst [vmem:[#allocation13_spill] sm:$0xff] %v3404_v38  ;;  %v1594_v48 = vld [vmem:[%s4452_s3 + $0x30] sm:$0xff] }
 0x11e   : > { %1026 = vmatmul.f32.gmra.mxu1 %v3361_v63 }
 0x11f   : > { %1156 = vmatmul.f32.gmra.mxu3 %v2975_v45  ;;  %v832_v6 = vpop.f32.mrf.mxu2  ;;  %v582_v45 = vld [vmem:[%s4450_s1 + $0x5d8] sm:$0xff] }
 0x120   : > { %v833_v44 = vadd.f32 %v832_v6, %v768_v3  ;;  %1428 = vmatpush.msrb.mxu0 %v582_v45  ;;  %v2301_v45 = vld [vmem:[%s2713_s14 + $0x40] sm:$0xff] }
 0x121   : > { %v705_v7 = vpop.f32.mrf.mxu0 }
 0x122   : > { %v706_v16 = vadd.f32 %v705_v7, %v3019_v5  ;;  %v897_v26 = vpop.f32.mrf.mxu3  ;;  %v2299_v7 = vld [vmem:[%s2713_s14 + $0x18] sm:$0xff] }
 0x123   : > { %v3381_v18 = vadd.f32 %v897_v26, %v833_v44  ;;  %v770_v21 = vpop.f32.mrf.mxu1  ;;  %v2298_v44 = vld [vmem:[%s2713_s14 + $0x8] sm:$0xff] }
 0x124   : > { %964 = vmatmul.f32.gmra.mxu0 %v3375_v12  ;;  %2231 = vmatmul.msk.f32.gmra.mxu2 %vm597_vm0, %v3378_v13  ;;  %v771_v30 = vadd.f32 %v770_v21, %v706_v16  ;;  %v2300_v16 = vld [vmem:[%s2713_s14 + $0x10] sm:$0xff] }
 0x125   : > { %v1610_v13 = vld [vmem:[%s4452_s3 + $0xb0] sm:$0xff] }
 0x126   : > { %1029 = vmatmul.f32.gmra.mxu1 %v3384_v50  ;;  %v2327_v50 = vld [vmem:[%s2713_s14 + $0x208] sm:$0xff] }
 0x127   : > { %1159 = vmatmul.f32.gmra.mxu3 %v2994_v54  ;;  %v835_v34 = vpop.f32.mrf.mxu2  ;;  %v580_v54 = vld [vmem:[%s4450_s1 + $0x5c8] sm:$0xff] }
 0x128   : > { %v836_v32 = vadd.f32 %v835_v34, %v771_v30  ;;  %1429 = vmatpush.msrb.mxu0 %v580_v54  ;;  %v2302_v30 = vld [vmem:[%s2713_s14 + $0x50] sm:$0xff]  ;;  %v576_v34 = vld [vmem:[%s4450_s1 + $0x5a8] sm:$0xff] }
 0x129   : > { %v708_v35 = vpop.f32.mrf.mxu0 }
 0x12a   : > { %v709_v56 = vadd.f32 %v708_v35, %v3019_v5  ;;  %v900_v41 = vpop.f32.mrf.mxu3 }
 0x12b   : > { %v3401_v10 = vadd.f32 %v900_v41, %v836_v32  ;;  %v773_v33 = vpop.f32.mrf.mxu1  ;;  %v2303_v32 = vld [vmem:[%s2713_s14 + $0x48] sm:$0xff] }
 0x12c   : > { %967 = vmatmul.f32.gmra.mxu0 %v3395_v36  ;;  %2232 = vmatmul.msk.f32.gmra.mxu2 %vm597_vm0, %v3398_v37  ;;  %v774_v5 = vadd.f32 %v773_v33, %v709_v56  ;;  %v2304_v56 = vld [vmem:[%s2713_s14 + $0x78] sm:$0xff]  ;;  %v2305_v41 = vld [vmem:[%s2713_s14 + $0x88] sm:$0xff] }
 0x12d   : > { %4496 = vst [vmem:[#allocation12_spill] sm:$0xff] %v3401_v10  ;;  %v574_v33 = vld [vmem:[%s4450_s1 + $0x598] sm:$0xff] }
 0x12e   : > { %1032 = vmatmul.f32.gmra.mxu1 %v3404_v38 }
 0x12f   : > { %1162 = vmatmul.f32.gmra.mxu3 %v3007_v61  ;;  %v838_v53 = vpop.f32.mrf.mxu2  ;;  %v578_v61 = vld [vmem:[%s4450_s1 + $0x5b8] sm:$0xff] }
 0x130   : > { %v839_v59 = vadd.f32 %v838_v53, %v774_v5  ;;  %1430 = vmatpush.msrb.mxu0 %v578_v61  ;;  %v2306_v5 = vld [vmem:[%s2713_s14 + $0x80] sm:$0xff] }
 0x131   : > { %v3414_v0 = vpop.f32.mrf.mxu0 }
 0x132   : > { %v903_v2 = vpop.f32.mrf.mxu3  ;;  %1431 = vmatpush.msrb.mxu0 %v576_v34  ;;  %v570_v34 = vld [vmem:[%s4450_s1 + $0x578] sm:$0xff] }
 0x133   : > { %v3416_v3 = vadd.f32 %v903_v2, %v839_v59  ;;  %v3418_v6 = vpop.f32.mrf.mxu1  ;;  %v2307_v59 = vld [vmem:[%s2713_s14 + $0xb0] sm:$0xff]  ;;  %v2308_v2 = vld [vmem:[%s2713_s14 + $0xc0] sm:$0xff] }
 0x134   : > { %1182 = vmatmul.f32.vlgmr.msra.gmra.mxu0 %v2298_v44  ;;  %1312 = vmatmul.f32.vlgmr.msra.gmra.mxu2 %v2299_v7  ;;  %v572_v44 = vld [vmem:[%s4450_s1 + $0x588] sm:$0xff]  ;;  %v2309_v7 = vld [vmem:[%s2713_s14 + $0xb8] sm:$0xff] }
 0x135   : > { %4498 = vst [vmem:[#allocation14_spill] sm:$0xff] %v3416_v3  ;;  %1432 = vmatpush.msrb.mxu0 %v574_v33 }
 0x136   : > { %1247 = vmatmul.f32.vlgmr.msra.gmra.mxu1 %v2300_v16 }
 0x137   : > { %1377 = vmatmul.f32.vlgmr.msra.gmra.mxu3 %v3025_v8  ;;  %v3447_v54 = vpop.f32.mrf.mxu2  ;;  %1433 = vmatpush.msrb.mxu0 %v572_v44 }
 0x139   : > { %v3427_v26 = vpop.f32.mrf.mxu0  ;;  %1434 = vmatpush.msrb.mxu0 %v570_v34  ;;  %v2317_v34 = vld [vmem:[%s2713_s14 + $0x168] sm:$0xff] }
 0x13b   : > { %v3429_v21 = vpop.f32.mrf.mxu1 }
 0x13c   : > { %1185 = vmatmul.f32.gmra.mxu0 %v2301_v45  ;;  %1315 = vmatmul.f32.gmra.mxu2 %v2302_v30  ;;  %v2310_v45 = vld [vmem:[%s2713_s14 + $0xe8] sm:$0xff]  ;;  %v2311_v30 = vld [vmem:[%s2713_s14 + $0xf8] sm:$0xff] }
 0x13e   : > { %1250 = vmatmul.f32.gmra.mxu1 %v2303_v32  ;;  %v2312_v32 = vld [vmem:[%s2713_s14 + $0xf0] sm:$0xff] }
 0x13f   : > { %1380 = vmatmul.f32.gmra.mxu3 %v3040_v23 }
 0x141   : > { %v3438_v8 = vpop.f32.mrf.mxu0 }
 0x143   : > { %v3440_v35 = vpop.f32.mrf.mxu1 }
 0x144   : > { %1188 = vmatmul.f32.gmra.mxu0 %v2304_v56  ;;  %1318 = vmatmul.f32.gmra.mxu2 %v2305_v41 }
 0x146   : > { %1253 = vmatmul.f32.gmra.mxu1 %v2306_v5  ;;  %v2313_v5 = vld [vmem:[%s2713_s14 + $0x120] sm:$0xff] }
 0x147   : > { %1383 = vmatmul.f32.gmra.mxu3 %v3057_v39  ;;  %v3462_v39 = vpop.f32.mrf.mxu2 }
 0x149   : > { %v3451_v23 = vpop.f32.mrf.mxu0 }
 0x14b   : > { %v3453_v53 = vpop.f32.mrf.mxu1 }
 0x14c   : > { %1191 = vmatmul.f32.gmra.mxu0 %v2307_v59  ;;  %1321 = vmatmul.f32.gmra.mxu2 %v2308_v2  ;;  %v2314_v59 = vld [vmem:[%s2713_s14 + $0x130] sm:$0xff]  ;;  %v2315_v2 = vld [vmem:[%s2713_s14 + $0x128] sm:$0xff] }
 0x14e   : > { %1256 = vmatmul.f32.gmra.mxu1 %v2309_v7 }
 0x14f   : > { %1386 = vmatmul.f32.gmra.mxu3 %v3074_v55  ;;  %v588_v55 = vld [vmem:[%s4450_s1 + $0x608] sm:$0xff]  ;;  %v3480_v41 = vpop.f32.mrf.mxu2 }
 0x150   : > { %1506 = vmatpush.msrb.mxu1 %v588_v55  ;;  %v2318_v55 = vld [vmem:[%s2713_s14 + $0x160] sm:$0xff] }
 0x151   : > { %v3464_v61 = vpop.f32.mrf.mxu0 }
 0x153   : > { %v3466_v16 = vpop.f32.mrf.mxu1 }
 0x154   : > { %1194 = vmatmul.f32.gmra.mxu0 %v2310_v45  ;;  %1324 = vmatmul.f32.gmra.mxu2 %v2311_v30  ;;  %v2316_v30 = vld [vmem:[%s2713_s14 + $0x158] sm:$0xff] }
 0x156   : > { %1259 = vmatmul.f32.gmra.mxu1 %v2312_v32  ;;  %v566_v32 = vld [vmem:[%s4450_s1 + $0x558] sm:$0xff] }
 0x157   : > { %1389 = vmatmul.f32.gmra.mxu3 %v3091_v9  ;;  %v568_v9 = vld [vmem:[%s4450_s1 + $0x568] sm:$0xff]  ;;  %v3495_v45 = vpop.f32.mrf.mxu2 }
 0x158   : > { %1435 = vmatpush.msrb.mxu0 %v568_v9  ;;  %v2319_v9 = vld [vmem:[%s2713_s14 + $0x190] sm:$0xff] }
 0x159   : > { %v3478_v56 = vpop.f32.mrf.mxu0 }
 0x15a   : > { %1436 = vmatpush.msrb.mxu0 %v566_v32 }
 0x15b   : > { %v3482_v33 = vpop.f32.mrf.mxu1 }
 0x15c   : > { %1197 = vmatmul.f32.gmra.mxu0 %v2313_v5  ;;  %1327 = vmatmul.f32.gmra.mxu2 %v2314_v59 }
 0x15e   : > { %1262 = vmatmul.f32.gmra.mxu1 %v2315_v2  ;;  %v2320_v2 = vld [vmem:[%s2713_s14 + $0x1a0] sm:$0xff] }
 0x15f   : > { %1392 = vmatmul.f32.gmra.mxu3 %v3108_v27  ;;  %v3504_v27 = vpop.f32.mrf.mxu3 }
 0x160   : > { %4499 = vst [vmem:[#allocation15_spill] sm:$0xff] %v3504_v27  ;;  %v1602_v27 = vld [vmem:[%s4452_s3 + $0x70] sm:$0xff] }
 0x161   : > { %v3491_v44 = vpop.f32.mrf.mxu0 }
 0x163   : > { %v3493_v7 = vpop.f32.mrf.mxu1 }
 0x164   : > { %1200 = vmatmul.f32.gmra.mxu0 %v2316_v30  ;;  %1330 = vmatmul.f32.gmra.mxu2 %v2317_v34  ;;  %v564_v30 = vld [vmem:[%s4450_s1 + $0x548] sm:$0xff]  ;;  %v3515_v34 = vpop.f32.mrf.mxu2 }
 0x165   : > { %1437 = vmatpush.msrb.mxu0 %v564_v30  ;;  %v562_v30 = vld [vmem:[%s4450_s1 + $0x538] sm:$0xff] }
 0x166   : > { %1265 = vmatmul.f32.gmra.mxu1 %v2318_v55 }
 0x167   : > { %1395 = vmatmul.f32.gmra.mxu3 %v3125_v46  ;;  %v2321_v46 = vld [vmem:[%s2713_s14 + $0x198] sm:$0xff]  ;;  %v3521_v55 = vpop.f32.mrf.mxu3  ;;  %1438 = vmatpush.msrb.mxu0 %v562_v30 }
 0x168   : > { %4500 = vst [vmem:[#allocation16_spill] sm:$0xff] %v3521_v55  ;;  %v1614_v55 = vld [vmem:[%s4452_s3 + $0xd0] sm:$0xff] }
 0x169   : > { %v3506_v5 = vpop.f32.mrf.mxu0 }
 0x16b   : > { %v3508_v59 = vpop.f32.mrf.mxu1 }
 0x16c   : > { %1203 = vmatmul.f32.gmra.mxu0 %v2319_v9  ;;  %1333 = vmatmul.f32.gmra.mxu2 %v2320_v2  ;;  %v2322_v9 = vld [vmem:[%s2713_s14 + $0x1c8] sm:$0xff]  ;;  %v2323_v2 = vld [vmem:[%s2713_s14 + $0x1d8] sm:$0xff] }
 0x16e   : > { %1268 = vmatmul.f32.gmra.mxu1 %v2321_v46  ;;  %v1618_v46 = vld [vmem:[%s4452_s3 + $0xf0] sm:$0xff] }
 0x16f   : > { %1398 = vmatmul.f32.gmra.mxu3 %v3142_v20  ;;  %1658 = vmatpush.msrb.mxu2 %v1618_v46  ;;  %v2324_v20 = vld [vmem:[%s2713_s14 + $0x1d0] sm:$0xff]  ;;  %v2325_v46 = vld [vmem:[%s2713_s14 + $0x200] sm:$0xff] }
 0x171   : > { %v3519_v32 = vpop.f32.mrf.mxu0 }
 0x173   : > { %v3523_v37 = vpop.f32.mrf.mxu1 }
 0x174   : > { %1206 = vmatmul.f32.gmra.mxu0 %v2322_v9  ;;  %1336 = vmatmul.f32.gmra.mxu2 %v2323_v2  ;;  %v1616_v9 = vld [vmem:[%s4452_s3 + $0xe0] sm:$0xff]  ;;  %v3538_v2 = vpop.f32.mrf.mxu2 }
 0x175   : > { %1659 = vmatpush.msrb.mxu2 %v1616_v9  ;;  %v560_v9 = vld [vmem:[%s4450_s1 + $0x528] sm:$0xff] }
 0x176   : > { %1271 = vmatmul.f32.gmra.mxu1 %v2324_v20  ;;  %v2326_v20 = vld [vmem:[%s2713_s14 + $0x210] sm:$0xff]  ;;  %1439 = vmatpush.msrb.mxu0 %v560_v9 }
 0x177   : > { %1401 = vmatmul.f32.gmra.mxu3 %v3159_v17  ;;  %1660 = vmatpush.msrb.mxu2 %v1614_v55  ;;  %v1612_v17 = vld [vmem:[%s4452_s3 + $0xc0] sm:$0xff]  ;;  %v3558_v55 = vpop.f32.mrf.mxu3 }
 0x178   : > { %4501 = vst [vmem:[#allocation17_spill] sm:$0xff] %v3558_v55  ;;  %v1606_v55 = vld [vmem:[%s4452_s3 + $0x90] sm:$0xff] }
 0x179   : > { %v3540_v38 = vpop.f32.mrf.mxu0  ;;  %1661 = vmatpush.msrb.mxu2 %v1612_v17 }
 0x17b   : > { %v3545_v30 = vpop.f32.mrf.mxu1  ;;  %1662 = vmatpush.msrb.mxu2 %v1610_v13  ;;  %v2328_v13 = vld [vmem:[%s2713_s14 + $0x238] sm:$0xff] }
 0x17c   : > { %1209 = vmatmul.f32.gmra.mxu0 %v2325_v46  ;;  %1339 = vmatmul.f32.gmra.mxu2 %v2326_v20  ;;  %v1608_v46 = vld [vmem:[%s4452_s3 + $0xa0] sm:$0xff]  ;;  %v3570_v17 = vpop.f32.mrf.mxu2 }
 0x17d   : > { %1663 = vmatpush.msrb.mxu2 %v1608_v46  ;;  %v558_v46 = vld [vmem:[%s4450_s1 + $0x518] sm:$0xff] }
 0x17e   : > { %1274 = vmatmul.f32.gmra.mxu1 %v2327_v50  ;;  %v2329_v50 = vld [vmem:[%s2713_s14 + $0x248] sm:$0xff]  ;;  %1440 = vmatpush.msrb.mxu0 %v558_v46 }
 0x17f   : > { %1404 = vmatmul.f32.gmra.mxu3 %v3185_v40  ;;  %1664 = vmatpush.msrb.mxu2 %v1606_v55  ;;  %v1604_v40 = vld [vmem:[%s4452_s3 + $0x80] sm:$0xff]  ;;  %v3586_v3 = vpop.f32.mrf.mxu3 }
 0x180   : > { %v2330_v55 = vld [vmem:[%s2713_s14 + $0x240] sm:$0xff]  ;;  %4502 = vst [vmem:[#allocation18_spill] sm:$0xff] %v3586_v3 }
 0x181   : > { %v3565_v20 = vpop.f32.mrf.mxu0  ;;  %1665 = vmatpush.msrb.mxu2 %v1604_v40  ;;  %v1598_v40 = vld [vmem:[%s4452_s3 + $0x50] sm:$0xff]  ;;  %v2332_v3 = vld [vmem:[%s2713_s14 + $0x280] sm:$0xff] }
 0x183   : > { %v3572_v9 = vpop.f32.mrf.mxu1  ;;  %1666 = vmatpush.msrb.mxu2 %v1602_v27 }
 0x184   : > { %1212 = vmatmul.f32.gmra.mxu0 %v2328_v13  ;;  %1342 = vmatmul.f32.gmra.mxu2 %v2329_v50  ;;  %v1600_v13 = vld [vmem:[%s4452_s3 + $0x60] sm:$0xff]  ;;  %v3602_v27 = vpop.f32.mrf.mxu2 }
 0x185   : > { %1667 = vmatpush.msrb.mxu2 %v1600_v13  ;;  %v556_v13 = vld [vmem:[%s4450_s1 + $0x508] sm:$0xff] }
 0x186   : > { %1277 = vmatmul.f32.gmra.mxu1 %v2330_v55  ;;  %v2331_v55 = vld [vmem:[%s2713_s14 + $0x270] sm:$0xff]  ;;  %1441 = vmatpush.msrb.mxu0 %v556_v13 }
 0x187   : > { %1407 = vmatmul.f32.gmra.mxu3 %v3226_v1  ;;  %1668 = vmatpush.msrb.mxu2 %v1598_v40  ;;  %v1596_v1 = vld [vmem:[%s4452_s3 + $0x40] sm:$0xff]  ;;  %v2333_v40 = vld [vmem:[%s2713_s14 + $0x278] sm:$0xff] }
 0x189   : > { %v3592_v50 = vpop.f32.mrf.mxu0  ;;  %1669 = vmatpush.msrb.mxu2 %v1596_v1  ;;  %v1590_v1 = vld [vmem:[%s4452_s3 + $0x10] sm:$0xff] }
 0x18b   : > { %v3597_v46 = vpop.f32.mrf.mxu1  ;;  %1670 = vmatpush.msrb.mxu2 %v1594_v48  ;;  %v2334_v48 = vld [vmem:[%s2713_s14 + $0x2a8] sm:$0xff] }
 0x18c   : > { %1215 = vmatmul.f32.gmra.mxu0 %v2331_v55  ;;  %1345 = vmatmul.f32.gmra.mxu2 %v2332_v3  ;;  %v1592_v3 = vld [vmem:[%s4452_s3 + $0x20] sm:$0xff]  ;;  %v3617_v55 = vpop.f32.mrf.mxu3 }
 0x18d   : > { %4503 = vst [vmem:[#allocation19_spill] sm:$0xff] %v3617_v55  ;;  %1671 = vmatpush.msrb.mxu2 %v1592_v3  ;;  %v3631_v3 = vpop.f32.mrf.mxu2  ;;  %v2336_v55 = vld [vmem:[%s2713_s14 + $0x2b0] sm:$0xff] }
 0x18e   : > { %1280 = vmatmul.f32.gmra.mxu1 %v2333_v40  ;;  %v2335_v40 = vld [vmem:[%s2713_s14 + $0x2b8] sm:$0xff] }
 0x18f   : > { %1410 = vmatmul.f32.gmra.mxu3 %v3267_v11  ;;  %1672 = vmatpush.msrb.mxu2 %v1590_v1  ;;  %v1588_v11 = vld [vmem:[%s4452_s3] sm:$0xff]  ;;  %v1650_v1 = vld [vmem:[%s4452_s3 + $0x1f0] sm:$0xff] }
 0x190   : > { %1723 = vmatpush.msrb.mxu3 %v1650_v1  ;;  %v1648_v1 = vld [vmem:[%s4452_s3 + $0x1e0] sm:$0xff] }
 0x191   : > { %v3619_v63 = vpop.f32.mrf.mxu0  ;;  %1673 = vmatpush.msrb.mxu2 %v1588_v11  ;;  %v2338_v11 = vld [vmem:[%s2713_s14 + $0x2f0] sm:$0xff] }
 0x192   : > { %1724 = vmatpush.msrb.mxu3 %v1648_v1  ;;  %v924_v1 = vadd.f32 %v3414_v0, %v3044_v28  ;;  %v2344_v28 = vld [vmem:[%s2713_s14 + $0x360] sm:$0xff] }
 0x193   : > { %v3624_v13 = vpop.f32.mrf.mxu1 }
 0x194   : > { %1218 = vmatmul.f32.gmra.mxu0 %v2334_v48  ;;  %1348 = vmatmul.f32.gmra.mxu2 %v2335_v40  ;;  %v3640_v14 = vpop.f32.mrf.mxu3 }
 0x195   : > { %4505 = vst [vmem:[#allocation21_spill] sm:$0xff] %v3640_v14  ;;  %v3651_v40 = vpop.f32.mrf.mxu2  ;;  %v2340_v14 = vld [vmem:[%s2713_s14 + $0x318] sm:$0xff] }
 0x196   : > { %1283 = vmatmul.f32.gmra.mxu1 %v2336_v55  ;;  %v2339_v55 = vld [vmem:[%s2713_s14 + $0x2e8] sm:$0xff] }
 0x197   : > { %1413 = vmatmul.f32.gmra.mxu3 %v3311_v22  ;;  %v1619_v22 = vld [vmem:[%s4452_s3 + $0xf8] sm:$0xff] }
 0x198   : > { %1788 = vmatpush.msra.mxu0 %v1619_v22 }
 0x199   : > { %v3638_v10 = vpop.f32.mrf.mxu0 }
 0x19a   : > { %4504 = vst [vmem:[#allocation20_spill] sm:$0xff] %v3638_v10  ;;  %v1617_v10 = vld [vmem:[%s4452_s3 + $0xe8] sm:$0xff] }
 0x19b   : > { %v3642_v48 = vpop.f32.mrf.mxu1  ;;  %1789 = vmatpush.msra.mxu0 %v1617_v10  ;;  %v989_v10 = vadd.f32 %v3418_v6, %v924_v1  ;;  %v927_v6 = vadd.f32 %v3427_v26, %v3061_v43  ;;  %v2346_v43 = vld [vmem:[%s2713_s14 + $0x28] sm:$0xff] }
 0x19c   : > { %4506 = vst [vmem:[#allocation22_spill] sm:$0xff] %v3642_v48  ;;  %1221 = vmatmul.f32.gmra.mxu0 %v2337_v62  ;;  %1351 = vmatmul.f32.gmra.mxu2 %v2338_v11  ;;  %v1651_v62 = vld [vmem:[%s4452_s3 + $0x1f8] sm:$0xff]  ;;  %v3665_v22 = vpop.f32.mrf.mxu3  ;;  %v2342_v48 = vld [vmem:[%s2713_s14 + $0x320] sm:$0xff] }
 0x19d   : > { %1853 = vmatpush.msra.mxu1 %v1651_v62  ;;  %4508 = vst [vmem:[#allocation24_spill] sm:$0xff] %v3665_v22  ;;  %v1649_v62 = vld [vmem:[%s4452_s3 + $0x1e8] sm:$0xff]  ;;  %v2343_v22 = vld [vmem:[%s2713_s14 + $0x350] sm:$0xff]  ;;  %v3690_v0 = vadd.f32 %v3447_v54, %v989_v10  ;;  %v1644_v54 = vld [vmem:[%s4452_s3 + $0x1c0] sm:$0xff]  ;;  %v992_v10 = vadd.f32 %v3429_v21, %v927_v6  ;;  %v930_v21 = vadd.f32 %v3438_v8, %v3078_v60 }
 0x19e   : > { %1286 = vmatmul.f32.gmra.mxu1 %v2339_v55  ;;  %v1642_v6 = vld [vmem:[%s4452_s3 + $0x1b0] sm:$0xff] }
 0x19f   : > { %1416 = vmatmul.f32.gmra.mxu3 %v3349_v47  ;;  %v2341_v47 = vld [vmem:[%s2713_s14 + $0x328] sm:$0xff]  ;;  %1854 = vmatpush.msra.mxu1 %v1649_v62  ;;  %v4465_v1 = vmax.f32 %v3690_v0, 0.0  ;;  %v3719_v26 = vadd.f32 %v3462_v39, %v992_v10 }
 0x1a0   : > { %v1645_v39 = vld [vmem:[%s4452_s3 + $0x1c8] sm:$0xff] }
 0x1a1   : > { %v3659_v11 = vpop.f32.mrf.mxu0  ;;  %v4466_v10 = vmax.f32 %v3719_v26, 0.0 }
 0x1a3   : > { %v3661_v55 = vpop.f32.mrf.mxu1 }
 0x1a4   : > { %4507 = vst [vmem:[#allocation23_spill] sm:$0xff] %v3661_v55  ;;  %1224 = vmatmul.f32.gmra.mxu0 %v2340_v14  ;;  %1354 = vmatmul.f32.gmra.mxu2 %v2341_v47  ;;  %v1646_v14 = vld [vmem:[%s4452_s3 + $0x1d0] sm:$0xff]  ;;  %v3682_v47 = vpop.f32.mrf.mxu2  ;;  %v2345_v55 = vld [vmem:[%s2713_s14 + $0x358] sm:$0xff]  ;;  %v3696_v62 = vpop.f32.mrf.mxu3 }
 0x1a5   : > { %1725 = vmatpush.msrb.mxu3 %v1646_v14  ;;  %v1615_v14 = vld [vmem:[%s4452_s3 + $0xd8] sm:$0xff] }
 0x1a6   : > { %1289 = vmatmul.f32.gmra.mxu1 %v2342_v48  ;;  %1790 = vmatpush.msra.mxu0 %v1615_v14  ;;  %v2347_v14 = vld [vmem:[%s2713_s14 + $0x30] sm:$0xff] }
 0x1a7   : > { %1419 = vmatmul.f32.gmra.mxu3 %v3375_v12 }
 0x1a8   : > { %1726 = vmatpush.msrb.mxu3 %v1644_v54  ;;  %v1613_v54 = vld [vmem:[%s4452_s3 + $0xc8] sm:$0xff] }
 0x1a9   : > { %v3680_v48 = vpop.f32.mrf.mxu0  ;;  %1791 = vmatpush.msra.mxu0 %v1613_v54  ;;  %v2348_v54 = vld [vmem:[%s2713_s14 + $0x60] sm:$0xff] }
 0x1aa   : > { %1727 = vmatpush.msrb.mxu3 %v1642_v6  ;;  %v1611_v6 = vld [vmem:[%s4452_s3 + $0xb8] sm:$0xff] }
 0x1ab   : > { %v3684_v12 = vpop.f32.mrf.mxu1  ;;  %1792 = vmatpush.msra.mxu0 %v1611_v6 }
 0x1ac   : > { %1227 = vmatmul.f32.gmra.mxu0 %v2343_v22  ;;  %1357 = vmatmul.f32.gmra.mxu2 %v2344_v28  ;;  %v3713_v28 = vpop.f32.mrf.mxu2 }
 0x1ae   : > { %1292 = vmatmul.f32.gmra.mxu1 %v2345_v55  ;;  %v1647_v55 = vld [vmem:[%s4452_s3 + $0x1d8] sm:$0xff] }
 0x1af   : > { %1422 = vmatmul.f32.gmra.mxu3 %v3395_v36  ;;  %1855 = vmatpush.msra.mxu1 %v1647_v55 }
 0x1b1   : > { %v3707_v22 = vpop.f32.mrf.mxu0  ;;  %1856 = vmatpush.msra.mxu1 %v1645_v39  ;;  %v1643_v39 = vld [vmem:[%s4452_s3 + $0x1b8] sm:$0xff] }
 0x1b3   : > { %v3710_v36 = vpop.f32.mrf.mxu1  ;;  %1857 = vmatpush.msra.mxu1 %v1643_v39 }
 0x1b4   : > { %1442 = vmatmul.f32.vlgmr.msrb.gmra.mxu0 %v2346_v43  ;;  %1674 = vmatmul.f32.vlgmr.msrb.gmra.mxu2 %v4465_v1  ;;  %v3746_v8 = vpop.f32.mrf.mxu2  ;;  %v2349_v1 = vld [vmem:[%s2713_s14 + $0x68] sm:$0xff] }
 0x1b6   : > { %2233 = vmatmul.msk.f32.vlgmr.msrb.gmra.mxu1 %vm597_vm0, %v2347_v14  ;;  %v995_v14 = vadd.f32 %v3440_v35, %v930_v21  ;;  %v3753_v35 = vpop.f32.mrf.mxu3  ;;  %v933_v21 = vadd.f32 %v3451_v23, %v3095_v15  ;;  %v2351_v23 = vld [vmem:[%s2713_s14 + $0xa0] sm:$0xff] }
 0x1b8   : > { %v3744_v60 = vadd.f32 %v3480_v41, %v995_v14  ;;  %v1640_v41 = vld [vmem:[%s4452_s3 + $0x1a0] sm:$0xff]  ;;  %v998_v6 = vadd.f32 %v3453_v53, %v933_v21  ;;  %v936_v53 = vadd.f32 %v3464_v61, %v3112_v31  ;;  %v1641_v21 = vld [vmem:[%s4452_s3 + $0x1a8] sm:$0xff]  ;;  %v2352_v61 = vld [vmem:[%s2713_s14 + $0xd0] sm:$0xff] }
 0x1b9   : > { %v3734_v55 = vpop.f32.mrf.mxu0  ;;  %1728 = vmatpush.msrb.mxu3 %v1640_v41  ;;  %v1609_v41 = vld [vmem:[%s4452_s3 + $0xa8] sm:$0xff]  ;;  %1858 = vmatpush.msra.mxu1 %v1641_v21 }
 0x1ba   : > { %v4467_v14 = vmax.f32 %v3744_v60, 0.0  ;;  %v3773_v15 = vadd.f32 %v3495_v45, %v998_v6  ;;  %1793 = vmatpush.msra.mxu0 %v1609_v41  ;;  %v1638_v45 = vld [vmem:[%s4452_s3 + $0x190] sm:$0xff]  ;;  %v1001_v31 = vadd.f32 %v3466_v16, %v936_v53  ;;  %v939_v16 = vadd.f32 %v3478_v56, %v3129_v49  ;;  %v1636_v53 = vld [vmem:[%s4452_s3 + $0x180] sm:$0xff]  ;;  %v2354_v56 = vld [vmem:[%s2713_s14 + $0x108] sm:$0xff] }
 0x1bb   : > { %v3737_v43 = vpop.f32.mrf.mxu1  ;;  %1729 = vmatpush.msrb.mxu3 %v1638_v45  ;;  %v1607_v45 = vld [vmem:[%s4452_s3 + $0x98] sm:$0xff] }
 0x1bc   : > { %1445 = vmatmul.f32.gmra.mxu0 %v2348_v54  ;;  %1677 = vmatmul.f32.gmra.mxu2 %v4466_v10  ;;  %v2350_v10 = vld [vmem:[%s2713_s14 + $0x98] sm:$0xff]  ;;  %v1004_v49 = vadd.f32 %v3482_v33, %v939_v16  ;;  %v942_v33 = vadd.f32 %v3491_v44, %v3146_v4  ;;  %v1634_v16 = vld [vmem:[%s4452_s3 + $0x170] sm:$0xff]  ;;  %v2356_v4 = vld [vmem:[%s2713_s14 + $0x140] sm:$0xff] }
 0x1bd   : > { %1794 = vmatpush.msra.mxu0 %v1607_v45  ;;  %1730 = vmatpush.msrb.mxu3 %v1636_v53  ;;  %v2355_v53 = vld [vmem:[%s2713_s14 + $0x110] sm:$0xff] }
 0x1be   : > { %2234 = vmatmul.msk.f32.gmra.mxu1 %vm597_vm0, %v2349_v1  ;;  %v3790_v39 = vpop.f32.mrf.mxu3 }
 0x1bf   : > { %4509 = vst [vmem:[#allocation25_spill] sm:$0xff] %v3790_v39  ;;  %v2353_v39 = vld [vmem:[%s2713_s14 + $0xd8] sm:$0xff]  ;;  %1731 = vmatpush.msrb.mxu3 %v1634_v16  ;;  %v2357_v16 = vld [vmem:[%s2713_s14 + $0x148] sm:$0xff] }
 0x1c1   : > { %v3763_v1 = vpop.f32.mrf.mxu0 }
 0x1c3   : > { %v3766_v54 = vpop.f32.mrf.mxu1 }
 0x1c4   : > { %1448 = vmatmul.f32.gmra.mxu0 %v2350_v10  ;;  %1680 = vmatmul.f32.gmra.mxu2 %v4467_v14  ;;  %v3782_v10 = vpop.f32.mrf.mxu2  ;;  %v3802_v14 = vadd.f32 %v3515_v34, %v1001_v31  ;;  %v1639_v34 = vld [vmem:[%s4452_s3 + $0x198] sm:$0xff] }
 0x1c5   : > { %1859 = vmatpush.msra.mxu1 %v1639_v34  ;;  %v1605_v34 = vld [vmem:[%s4452_s3 + $0x88] sm:$0xff] }
 0x1c6   : > { %2235 = vmatmul.msk.f32.gmra.mxu1 %vm597_vm0, %v2351_v23  ;;  %v4468_v23 = vmax.f32 %v3773_v15, 0.0  ;;  %1795 = vmatpush.msra.mxu0 %v1605_v34  ;;  %v1007_v34 = vadd.f32 %v3493_v7, %v942_v33  ;;  %v1603_v7 = vld [vmem:[%s4452_s3 + $0x78] sm:$0xff]  ;;  %v945_v33 = vadd.f32 %v3506_v5, %v3163_v24 }
 0x1c8   : > { %1796 = vmatpush.msra.mxu0 %v1603_v7  ;;  %v1010_v7 = vadd.f32 %v3508_v59, %v945_v33  ;;  %v1633_v33 = vld [vmem:[%s4452_s3 + $0x168] sm:$0xff] }
 0x1c9   : > { %v3792_v6 = vpop.f32.mrf.mxu0 }
 0x1ca   : > { %v3885_v24 = vadd.f32 %v3602_v27, %v1010_v7  ;;  %v1630_v27 = vld [vmem:[%s4452_s3 + $0x150] sm:$0xff] }
 0x1cb   : > { %v3795_v41 = vpop.f32.mrf.mxu1 }
 0x1cc   : > { %1451 = vmatmul.f32.gmra.mxu0 %v2352_v61  ;;  %1683 = vmatmul.f32.gmra.mxu2 %v4468_v23  ;;  %v3820_v31 = vpop.f32.mrf.mxu2  ;;  %v3822_v61 = vpop.f32.mrf.mxu3  ;;  %v3831_v23 = vadd.f32 %v3538_v2, %v1004_v49  ;;  %v1637_v2 = vld [vmem:[%s4452_s3 + $0x188] sm:$0xff] }
 0x1cd   : > { %4510 = vst [vmem:[#allocation26_spill] sm:$0xff] %v3822_v61  ;;  %1860 = vmatpush.msra.mxu1 %v1637_v2  ;;  %v3860_v61 = vadd.f32 %v3570_v17, %v1007_v34  ;;  %v1632_v2 = vld [vmem:[%s4452_s3 + $0x160] sm:$0xff]  ;;  %v1635_v17 = vld [vmem:[%s4452_s3 + $0x178] sm:$0xff] }
 0x1ce   : > { %2236 = vmatmul.msk.f32.gmra.mxu1 %vm597_vm0, %v2353_v39  ;;  %v4469_v39 = vmax.f32 %v3802_v14, 0.0  ;;  %1732 = vmatpush.msrb.mxu3 %v1632_v2  ;;  %v1601_v2 = vld [vmem:[%s4452_s3 + $0x68] sm:$0xff] }
 0x1cf   : > { %1861 = vmatpush.msra.mxu1 %v1635_v17  ;;  %1797 = vmatpush.msra.mxu0 %v1601_v2  ;;  %v4472_v17 = vmax.f32 %v3885_v24, 0.0 }
 0x1d0   : > { %1733 = vmatpush.msrb.mxu3 %v1630_v27  ;;  %v1599_v27 = vld [vmem:[%s4452_s3 + $0x58] sm:$0xff] }
 0x1d1   : > { %v3817_v21 = vpop.f32.mrf.mxu0  ;;  %1862 = vmatpush.msra.mxu1 %v1633_v33  ;;  %1798 = vmatpush.msra.mxu0 %v1599_v27 }
 0x1d3   : > { %v3824_v45 = vpop.f32.mrf.mxu1 }
 0x1d4   : > { %1454 = vmatmul.f32.gmra.mxu0 %v2354_v56  ;;  %1686 = vmatmul.f32.gmra.mxu2 %v4469_v39  ;;  %v4470_v56 = vmax.f32 %v3831_v23, 0.0  ;;  %v3852_v39 = vpop.f32.mrf.mxu2  ;;  %v3857_v44 = vpop.f32.mrf.mxu3 }
 0x1d5   : > { %4511 = vst [vmem:[#allocation27_spill] sm:$0xff] %v3857_v44  ;;  %v2359_v44 = vld [vmem:[%s2713_s14 + $0x180] sm:$0xff] }
 0x1d6   : > { %2237 = vmatmul.msk.f32.gmra.mxu1 %vm597_vm0, %v2355_v53 }
 0x1d9   : > { %v3846_v49 = vpop.f32.mrf.mxu0 }
 0x1db   : > { %v3849_v53 = vpop.f32.mrf.mxu1 }
 0x1dc   : > { %1457 = vmatmul.f32.gmra.mxu0 %v2356_v4  ;;  %1689 = vmatmul.f32.gmra.mxu2 %v4470_v56  ;;  %v4471_v4 = vmax.f32 %v3860_v61, 0.0  ;;  %v2358_v56 = vld [vmem:[%s2713_s14 + $0x178] sm:$0xff]  ;;  %v3887_v5 = vpop.f32.mrf.mxu2  ;;  %v3894_v59 = vpop.f32.mrf.mxu3 }
 0x1de   : > { %2238 = vmatmul.msk.f32.gmra.mxu1 %vm597_vm0, %v2357_v16 }
 0x1e1   : > { %v3875_v34 = vpop.f32.mrf.mxu0 }
 0x1e3   : > { %v3878_v16 = vpop.f32.mrf.mxu1 }
 0x1e4   : > { %1460 = vmatmul.f32.gmra.mxu0 %v2358_v56  ;;  %1692 = vmatmul.f32.gmra.mxu2 %v4471_v4  ;;  %v948_v56 = vadd.f32 %v3519_v32, %v3195_v51  ;;  %v2360_v4 = vld [vmem:[%s2713_s14 + $0x1b0] sm:$0xff]  ;;  %v2361_v32 = vld [vmem:[%s2713_s14 + $0x1b8] sm:$0xff]  ;;  %v3931_v33 = vpop.f32.mrf.mxu3 }
 0x1e5   : > { %4512 = vst [vmem:[#allocation28_spill] sm:$0xff] %v3931_v33  ;;  %v2363_v33 = vld [vmem:[%s2713_s14 + $0x1f0] sm:$0xff] }
 0x1e6   : > { %2239 = vmatmul.msk.f32.gmra.mxu1 %vm597_vm0, %v2359_v44  ;;  %v1013_v2 = vadd.f32 %v3523_v37, %v948_v56  ;;  %v951_v37 = vadd.f32 %v3540_v38, %v3236_v19  ;;  %v1631_v56 = vld [vmem:[%s4452_s3 + $0x158] sm:$0xff]  ;;  %v2362_v38 = vld [vmem:[%s2713_s14 + $0x1e8] sm:$0xff] }
 0x1e7   : > { %1863 = vmatpush.msra.mxu1 %v1631_v56 }
 0x1e8   : > { %v3914_v51 = vadd.f32 %v3631_v3, %v1013_v2  ;;  %v1628_v3 = vld [vmem:[%s4452_s3 + $0x140] sm:$0xff]  ;;  %v1016_v19 = vadd.f32 %v3545_v30, %v951_v37  ;;  %v954_v30 = vadd.f32 %v3565_v20, %v3279_v52  ;;  %v1626_v37 = vld [vmem:[%s4452_s3 + $0x130] sm:$0xff] }
 0x1e9   : > { %v3904_v44 = vpop.f32.mrf.mxu0  ;;  %1734 = vmatpush.msrb.mxu3 %v1628_v3  ;;  %v1597_v3 = vld [vmem:[%s4452_s3 + $0x48] sm:$0xff]  ;;  %v2364_v20 = vld [vmem:[%s2713_s14 + $0x220] sm:$0xff] }
 0x1ea   : > { %1799 = vmatpush.msra.mxu0 %v1597_v3  ;;  %v1019_v52 = vadd.f32 %v3572_v9, %v954_v30  ;;  %v957_v9 = vadd.f32 %v3592_v50, %v3323_v29  ;;  %v1624_v30 = vld [vmem:[%s4452_s3 + $0x120] sm:$0xff] }
 0x1eb   : > { %v3907_v7 = vpop.f32.mrf.mxu1  ;;  %1735 = vmatpush.msrb.mxu3 %v1626_v37  ;;  %v2365_v37 = vld [vmem:[%s2713_s14 + $0x228] sm:$0xff] }
 0x1ec   : > { %1463 = vmatmul.f32.gmra.mxu0 %v2360_v4  ;;  %1695 = vmatmul.f32.gmra.mxu2 %v4472_v17  ;;  %v3923_v4 = vpop.f32.mrf.mxu2  ;;  %v3943_v17 = vadd.f32 %v3651_v40, %v1016_v19  ;;  %v1629_v40 = vld [vmem:[%s4452_s3 + $0x148] sm:$0xff] }
 0x1ed   : > { %1864 = vmatpush.msra.mxu1 %v1629_v40  ;;  %v1595_v40 = vld [vmem:[%s4452_s3 + $0x38] sm:$0xff]  ;;  %1736 = vmatpush.msrb.mxu3 %v1624_v30  ;;  %v2366_v30 = vld [vmem:[%s2713_s14 + $0x260] sm:$0xff] }
 0x1ee   : > { %2240 = vmatmul.msk.f32.gmra.mxu1 %vm597_vm0, %v2361_v32  ;;  %v4473_v32 = vmax.f32 %v3914_v51, 0.0  ;;  %1800 = vmatpush.msra.mxu0 %v1595_v40  ;;  %v1022_v40 = vadd.f32 %v3597_v46, %v957_v9  ;;  %v960_v46 = vadd.f32 %v3619_v63, %v3358_v58 }
 0x1f0   : > { %v4001_v50 = vadd.f32 %v3713_v28, %v1022_v40  ;;  %v1625_v28 = vld [vmem:[%s4452_s3 + $0x128] sm:$0xff] }
 0x1f1   : > { %v3933_v2 = vpop.f32.mrf.mxu0 }
 0x1f2   : > { %4515 = vst [vmem:[#allocation31_spill] sm:$0xff] %v4001_v50  ;;  %v4475_v40 = vmax.f32 %v4001_v50, 0.0 }
 0x1f3   : > { %v3936_v27 = vpop.f32.mrf.mxu1 }
 0x1f4   : > { %1466 = vmatmul.f32.gmra.mxu0 %v2362_v38  ;;  %1698 = vmatmul.f32.gmra.mxu2 %v4473_v32  ;;  %v3961_v19 = vpop.f32.mrf.mxu2  ;;  %v3963_v38 = vpop.f32.mrf.mxu3  ;;  %v3972_v32 = vadd.f32 %v3682_v47, %v1019_v52  ;;  %v1627_v47 = vld [vmem:[%s4452_s3 + $0x138] sm:$0xff] }
 0x1f5   : > { %4513 = vst [vmem:[#allocation29_spill] sm:$0xff] %v3963_v38  ;;  %1865 = vmatpush.msra.mxu1 %v1627_v47  ;;  %v1593_v47 = vld [vmem:[%s4452_s3 + $0x28] sm:$0xff]  ;;  %v4522_v38 = vld [vmem:[#allocation12_spill] sm:$0xff] }
 0x1f6   : > { %2241 = vmatmul.msk.f32.gmra.mxu1 %vm597_vm0, %v2363_v33  ;;  %v4474_v33 = vmax.f32 %v3943_v17, 0.0  ;;  %1801 = vmatpush.msra.mxu0 %v1593_v47  ;;  %v1025_v47 = vadd.f32 %v3624_v13, %v960_v46  ;;  %v1623_v46 = vld [vmem:[%s4452_s3 + $0x118] sm:$0xff]  ;;  %v966_v50 = vadd.f32 %v3659_v11, %v4522_v38  ;;  %v2367_v11 = vld [vmem:[%s4451_s2] sm:$0x3] }
 0x1f7   : > { %1866 = vmatpush.msra.mxu1 %v1625_v28  ;;  %v4081_v38 = vperm.slane %v2367_v11, 1 }
 0x1f8   : > { %v4026_v58 = vadd.f32 %v3746_v8, %v1025_v47  ;;  %v1620_v8 = vld [vmem:[%s4452_s3 + $0x100] sm:$0xff] }
 0x1f9   : > { %v3958_v56 = vpop.f32.mrf.mxu0  ;;  %1867 = vmatpush.msra.mxu1 %v1623_v46  ;;  %v1621_v46 = vld [vmem:[%s4452_s3 + $0x108] sm:$0xff] }
 0x1fa   : > { %4516 = vst [vmem:[#allocation32_spill] sm:$0xff] %v4026_v58 }
 0x1fb   : > { %v3965_v3 = vpop.f32.mrf.mxu1  ;;  %1868 = vmatpush.msra.mxu1 %v1621_v46 }
 0x1fc   : > { %1469 = vmatmul.f32.gmra.mxu0 %v2364_v20  ;;  %1701 = vmatmul.f32.gmra.mxu2 %v4474_v33  ;;  %v4476_v20 = vmax.f32 %v3972_v32, 0.0  ;;  %v3993_v33 = vpop.f32.mrf.mxu2  ;;  %v3998_v29 = vpop.f32.mrf.mxu3 }
 0x1fd   : > { %4514 = vst [vmem:[#allocation30_spill] sm:$0xff] %v3998_v29 }
 0x1fe   : > { %2242 = vmatmul.msk.f32.gmra.mxu1 %vm597_vm0, %v2365_v37 }
 0x201   : > { %v3987_v52 = vpop.f32.mrf.mxu0 }
 0x203   : > { %v3990_v37 = vpop.f32.mrf.mxu1 }
 0x204   : > { %1472 = vmatmul.f32.gmra.mxu0 %v3239_v25  ;;  %1704 = vmatmul.f32.gmra.mxu2 %v4476_v20  ;;  %v1622_v25 = vld [vmem:[%s4452_s3 + $0x110] sm:$0xff]  ;;  %v4028_v63 = vpop.f32.mrf.mxu2  ;;  %v4035_v28 = vpop.f32.mrf.mxu3  ;;  %v4519_v20 = vld [vmem:[#allocation6_spill] sm:$0xff] }
 0x205   : > { %1737 = vmatpush.msrb.mxu3 %v1622_v25  ;;  %v1591_v25 = vld [vmem:[%s4452_s3 + $0x18] sm:$0xff] }
 0x206   : > { %2243 = vmatmul.msk.f32.gmra.mxu1 %vm597_vm0, %v2366_v30  ;;  %1802 = vmatpush.msra.mxu0 %v1591_v25  ;;  %v4518_v25 = vld [vmem:[#allocation22_spill] sm:$0xff] }
 0x207   : > { %1738 = vmatpush.msrb.mxu3 %v1620_v8  ;;  %v4521_v8 = vld [vmem:[#allocation5_spill] sm:$0xff] }
 0x209   : > { %v4016_v9 = vpop.f32.mrf.mxu0 }
 0x20b   : > { %v4019_v30 = vpop.f32.mrf.mxu1 }
 0x20c   : > { %1475 = vmatmul.f32.gmra.mxu0 %v3282_v57  ;;  %1707 = vmatmul.f32.gmra.mxu2 %v4475_v40  ;;  %v4517_v57 = vld [vmem:[#allocation20_spill] sm:$0xff] }
 0x20d   : > { %v963_v13 = vadd.f32 %v4517_v57, %v3381_v18  ;;  %v1589_v18 = vld [vmem:[%s4452_s3 + $0x8] sm:$0xff] }
 0x20e   : > { %2244 = vmatmul.msk.f32.gmra.mxu1 %vm597_vm0, %v3270_v42  ;;  %v4478_v42 = vmax.f32 %v4026_v58, 0.0  ;;  %1803 = vmatpush.msra.mxu0 %v1589_v18  ;;  %v4528_v58 = vld [vmem:[#allocation7_spill] sm:$0xff] }
 0x20f   : > { %v1028_v57 = vadd.f32 %v4518_v25, %v963_v13  ;;  %v4067_v13 = vpop.f32.mrf.mxu2 }
 0x211   : > { %v4045_v47 = vpop.f32.mrf.mxu0  ;;  %v4058_v29 = vadd.f32 %v3782_v10, %v1028_v57  ;;  %v4525_v57 = vld [vmem:[#allocation23_spill] sm:$0xff] }
 0x213   : > { %v4048_v40 = vpop.f32.mrf.mxu1  ;;  %4520 = vst [vmem:[#allocation20_spill] sm:$0xff] %v4058_v29  ;;  %v4480_v18 = vmax.f32 %v4058_v29, 0.0 }
 0x214   : > { %1478 = vmatmul.f32.gmra.mxu0 %v4519_v20  ;;  %1710 = vmatmul.f32.gmra.mxu2 %v4478_v42  ;;  %v1381_v20 = vpop.f32.mrf.mxu3  ;;  %v1031_v42 = vadd.f32 %v4525_v57, %v966_v50  ;;  %v1965_v57 = vld [vmem:[%s4454_s5 + $0x78] sm:$0xff] }
 0x215   : > { %1986 = vmatpush.msra.mxu2 %v1965_v57 }
 0x216   : > { %2245 = vmatmul.msk.f32.gmra.mxu1 %vm597_vm0, %v4521_v8  ;;  %v4526_v8 = vld [vmem:[#allocation8_spill] sm:$0xff]  ;;  %v4084_v46 = vadd.f32 %v3820_v31, %v1031_v42 }
 0x217   : > { %v4098_v31 = vpop.f32.mrf.mxu2 }
 0x218   : > { %4527 = vst [vmem:[#allocation5_spill] sm:$0xff] %v4084_v46  ;;  %v4482_v29 = vmax.f32 %v4084_v46, 0.0 }
 0x219   : > { %v4069_v25 = vpop.f32.mrf.mxu0 }
 0x21a   : > { %4523 = vst [vmem:[#allocation22_spill] sm:$0xff] %v4069_v25  ;;  %v4533_v25 = vld [vmem:[#allocation10_spill] sm:$0xff] }
 0x21b   : > { %v4072_v10 = vpop.f32.mrf.mxu1 }
 0x21c   : > { %4524 = vst [vmem:[#allocation6_spill] sm:$0xff] %v4072_v10  ;;  %1481 = vmatmul.f32.gmra.mxu0 %v4526_v8  ;;  %1713 = vmatmul.f32.gmra.mxu2 %v4480_v18  ;;  %v4529_v10 = vld [vmem:[#allocation14_spill] sm:$0xff]  ;;  %v4531_v18 = vld [vmem:[#allocation15_spill] sm:$0xff]  ;;  %v1384_v42 = vpop.f32.mrf.mxu3 }
 0x21d   : > { %v969_v50 = vadd.f32 %v3680_v48, %v4529_v10  ;;  %v1119_v11 = vadd.f32 %v4531_v18, %v4081_v38 }
 0x21e   : > { %2246 = vmatmul.msk.f32.gmra.mxu1 %vm597_vm0, %v4528_v58  ;;  %v1981_v58 = vld [vmem:[%s4454_s5 + $0xf8] sm:$0xff] }
 0x21f   : > { %2051 = vmatpush.msra.mxu3 %v1981_v58  ;;  %v1034_v10 = vadd.f32 %v3684_v12, %v969_v50  ;;  %v1184_v57 = vadd.f32 %v3707_v22, %v1119_v11  ;;  %v4536_v12 = vld [vmem:[#allocation16_spill] sm:$0xff]  ;;  %v1980_v22 = vld [vmem:[%s4454_s5 + $0xf0] sm:$0xff] }
 0x221   : > { %v4093_v8 = vpop.f32.mrf.mxu0  ;;  %v4110_v18 = vadd.f32 %v3852_v39, %v1034_v10  ;;  %v1249_v39 = vadd.f32 %v3710_v36, %v1184_v57  ;;  %2052 = vmatpush.msra.mxu3 %v1980_v22  ;;  %v4130_v10 = vpop.f32.mrf.mxu2  ;;  %v4539_v36 = vld [vmem:[#allocation11_spill] sm:$0xff]  ;;  %v1963_v22 = vld [vmem:[%s4454_s5 + $0x68] sm:$0xff] }
 0x222   : > { %4530 = vst [vmem:[#allocation12_spill] sm:$0xff] %v4093_v8  ;;  %v4535_v8 = vld [vmem:[#allocation9_spill] sm:$0xff] }
 0x223   : > { %v4103_v48 = vpop.f32.mrf.mxu1  ;;  %4534 = vst [vmem:[#allocation8_spill] sm:$0xff] %v4110_v18  ;;  %v4484_v50 = vmax.f32 %v4110_v18, 0.0 }
 0x224   : > { %4532 = vst [vmem:[#allocation23_spill] sm:$0xff] %v4103_v48  ;;  %1484 = vmatmul.f32.gmra.mxu0 %v4533_v25  ;;  %1716 = vmatmul.f32.gmra.mxu2 %v4482_v29  ;;  %v1964_v48 = vld [vmem:[%s4454_s5 + $0x70] sm:$0xff]  ;;  %v1122_v25 = vadd.f32 %v4536_v12, %v4081_v38  ;;  %v4538_v29 = vld [vmem:[#allocation13_spill] sm:$0xff] }
 0x225   : > { %1987 = vmatpush.msra.mxu2 %v1964_v48  ;;  %v1387_v48 = vpop.f32.mrf.mxu3 }
 0x226   : > { %2247 = vmatmul.msk.f32.gmra.mxu1 %vm597_vm0, %v4535_v8  ;;  %v1314_v8 = vadd.f32 %v3887_v5, %v1249_v39  ;;  %v1187_v12 = vadd.f32 %v3734_v55, %v1122_v25  ;;  %v4540_v39 = vld [vmem:[#allocation17_spill] sm:$0xff]  ;;  %v1979_v55 = vld [vmem:[%s4454_s5 + $0xe8] sm:$0xff] }
 0x227   : > { %1988 = vmatpush.msra.mxu2 %v1963_v22  ;;  %2053 = vmatpush.msra.mxu3 %v1979_v55 }
 0x228   : > { %v1379_v57 = vadd.f32 %v4035_v28, %v1314_v8  ;;  %v1252_v18 = vadd.f32 %v3737_v43, %v1187_v12  ;;  %v1962_v43 = vld [vmem:[%s4454_s5 + $0x60] sm:$0xff] }
 0x229   : > { %v4118_v58 = vpop.f32.mrf.mxu0  ;;  %1989 = vmatpush.msra.mxu2 %v1962_v43 }
 0x22a   : > { %v1317_v28 = vadd.f32 %v3923_v4, %v1252_v18 }
 0x22b   : > { %v4127_v11 = vpop.f32.mrf.mxu1 }
 0x22c   : > { %4537 = vst [vmem:[#allocation7_spill] sm:$0xff] %v4127_v11  ;;  %1487 = vmatmul.f32.gmra.mxu0 %v4538_v29  ;;  %1719 = vmatmul.f32.gmra.mxu2 %v4484_v50  ;;  %v1125_v29 = vadd.f32 %v4540_v39, %v4081_v38  ;;  %v1382_v39 = vadd.f32 %v1381_v20, %v1317_v28 }
 0x22d   : > { %v1390_v11 = vpop.f32.mrf.mxu3 }
 0x22e   : > { %2248 = vmatmul.msk.f32.gmra.mxu1 %vm597_vm0, %v4539_v36  ;;  %v4541_v36 = vmax.f32 %v3690_v0, 0.0  ;;  %v1190_v22 = vadd.f32 %v3763_v1, %v1125_v29  ;;  %v1978_v1 = vld [vmem:[%s4454_s5 + $0xe0] sm:$0xff] }
 0x22f   : > { %2054 = vmatpush.msra.mxu3 %v1978_v1 }
 0x230   : > { %v1255_v18 = vadd.f32 %v3766_v54, %v1190_v22  ;;  %v1961_v54 = vld [vmem:[%s4454_s5 + $0x58] sm:$0xff] }
 0x231   : > { %v1443_v5 = vpop.f32.mrf.mxu0  ;;  %1990 = vmatpush.msra.mxu2 %v1961_v54 }
 0x232   : > { %v1444_v50 = vadd.f32 %v1443_v5, %v1379_v57  ;;  %v4542_v57 = vld [vmem:[#allocation18_spill] sm:$0xff]  ;;  %v1320_v20 = vadd.f32 %v3961_v19, %v1255_v18  ;;  %v4543_v5 = vmax.f32 %v3719_v26, 0.0 }
 0x233   : > { %v1508_v25 = vpop.f32.mrf.mxu1  ;;  %v1128_v4 = vadd.f32 %v4542_v57, %v4081_v38 }
 0x234   : > { %v1509_v8 = vadd.f32 %v1508_v25, %v1444_v50  ;;  %1804 = vmatmul.f32.vlgmr.msra.gmra.mxu0 %v4541_v36  ;;  %v1385_v25 = vadd.f32 %v1384_v42, %v1320_v20  ;;  %v4544_v36 = vld [vmem:[#allocation19_spill] sm:$0xff] }
 0x235   : > { %v1193_v29 = vadd.f32 %v3792_v6, %v1128_v4  ;;  %v1393_v28 = vpop.f32.mrf.mxu3  ;;  %v1131_v19 = vadd.f32 %v4544_v36, %v4081_v38  ;;  %v1977_v6 = vld [vmem:[%s4454_s5 + $0xd8] sm:$0xff] }
 0x236   : > { %v1557_v46 = vmax.f32 %v1509_v8, 0.0  ;;  %2055 = vmatpush.msra.mxu3 %v1977_v6 }
 0x237   : > { %v1258_v22 = vadd.f32 %v3795_v41, %v1193_v29  ;;  %v1196_v57 = vadd.f32 %v3817_v21, %v1131_v19  ;;  %v1960_v41 = vld [vmem:[%s4454_s5 + $0x50] sm:$0xff]  ;;  %v4548_v19 = vld [vmem:[#allocation24_spill] sm:$0xff] }
 0x238   : > { %1739 = vmatmul.f32.vlgmr.msrb.gmra.mxu3 %v1557_v46  ;;  %1869 = vmatmul.f32.vlgmr.msra.gmra.mxu1 %v1557_v46  ;;  %v1976_v21 = vld [vmem:[%s4454_s5 + $0xd0] sm:$0xff] }
 0x239   : > { %v1446_v12 = vpop.f32.mrf.mxu0  ;;  %1991 = vmatpush.msra.mxu2 %v1960_v41  ;;  %2056 = vmatpush.msra.mxu3 %v1976_v21 }
 0x23a   : > { %v1447_v0 = vadd.f32 %v1446_v12, %v1382_v39  ;;  %v1323_v39 = vadd.f32 %v3993_v33, %v1258_v22  ;;  %v4545_v12 = vmax.f32 %v3744_v60, 0.0  ;;  %v4546_v33 = vld [vmem:[#allocation21_spill] sm:$0xff]  ;;  %v1261_v60 = vadd.f32 %v3824_v45, %v1196_v57  ;;  %v1959_v45 = vld [vmem:[%s4454_s5 + $0x48] sm:$0xff] }
 0x23b   : > { %v1511_v50 = vpop.f32.mrf.mxu1  ;;  %1992 = vmatpush.msra.mxu2 %v1959_v45  ;;  %v1137_v22 = vadd.f32 %v4548_v19, %v4081_v38 }
 0x23c   : > { %v1512_v46 = vadd.f32 %v1511_v50, %v1447_v0  ;;  %1807 = vmatmul.f32.gmra.mxu0 %v4543_v5  ;;  %v1388_v18 = vadd.f32 %v1387_v48, %v1323_v39  ;;  %v4181_v0 = vpop.f32.mrf.mxu2  ;;  %v1134_v50 = vadd.f32 %v4546_v33, %v4081_v38  ;;  %v1326_v5 = vadd.f32 %v4028_v63, %v1261_v60 }
 0x23d   : > { %v1396_v48 = vpop.f32.mrf.mxu3  ;;  %v4549_v39 = vmax.f32 %v3802_v14, 0.0 }
 0x23e   : > { %v1559_v55 = vmax.f32 %v1512_v46, 0.0 }
 0x240   : > { %1742 = vmatmul.f32.gmra.mxu3 %v1559_v55  ;;  %1872 = vmatmul.f32.gmra.mxu1 %v1559_v55  ;;  %v4547_v55 = vmax.f32 %v3773_v15, 0.0  ;;  %v1975_v15 = vld [vmem:[%s4454_s5 + $0xc8] sm:$0xff] }
 0x241   : > { %v1449_v8 = vpop.f32.mrf.mxu0  ;;  %2057 = vmatpush.msra.mxu3 %v1975_v15 }
 0x242   : > { %v1450_v26 = vadd.f32 %v1449_v8, %v1385_v25  ;;  %v1199_v25 = vadd.f32 %v3846_v49, %v1134_v50  ;;  %v1391_v8 = vadd.f32 %v1390_v11, %v1326_v5  ;;  %v4550_v50 = vmax.f32 %v3831_v23, 0.0 }
 0x243   : > { %v1514_v42 = vpop.f32.mrf.mxu1 }
 0x244   : > { %v1515_v43 = vadd.f32 %v1514_v42, %v1450_v26  ;;  %1810 = vmatmul.f32.gmra.mxu0 %v4545_v12  ;;  %v1264_v63 = vadd.f32 %v3849_v53, %v1199_v25  ;;  %v4202_v49 = vpop.f32.mrf.mxu2  ;;  %v1202_v12 = vadd.f32 %v3875_v34, %v1137_v22  ;;  %v1974_v34 = vld [vmem:[%s4454_s5 + $0xc0] sm:$0xff] }
 0x245   : > { %2058 = vmatpush.msra.mxu3 %v1974_v34 }
 0x246   : > { %v1561_v4 = vmax.f32 %v1515_v43, 0.0  ;;  %v1329_v6 = vadd.f32 %v4067_v13, %v1264_v63  ;;  %v1399_v43 = vpop.f32.mrf.mxu3  ;;  %v1140_v13 = vadd.f32 %v3696_v62, %v4081_v38  ;;  %v1267_v41 = vadd.f32 %v3878_v16, %v1202_v12 }
 0x248   : > { %1745 = vmatmul.f32.gmra.mxu3 %v1561_v4  ;;  %1875 = vmatmul.f32.gmra.mxu1 %v1561_v4  ;;  %v1394_v53 = vadd.f32 %v1393_v28, %v1329_v6  ;;  %v1958_v4 = vld [vmem:[%s4454_s5 + $0x40] sm:$0xff]  ;;  %v1332_v28 = vadd.f32 %v4098_v31, %v1267_v41  ;;  %v1143_v31 = vadd.f32 %v3753_v35, %v4081_v38 }
 0x249   : > { %v1452_v1 = vpop.f32.mrf.mxu0  ;;  %1993 = vmatpush.msra.mxu2 %v1958_v4 }
 0x24a   : > { %v1453_v20 = vadd.f32 %v1452_v1, %v1388_v18  ;;  %v1397_v16 = vadd.f32 %v1396_v48, %v1332_v28 }
 0x24b   : > { %v1517_v46 = vpop.f32.mrf.mxu1 }
 0x24c   : > { %v1518_v29 = vadd.f32 %v1517_v46, %v1453_v20  ;;  %1813 = vmatmul.f32.gmra.mxu0 %v4547_v55  ;;  %v4220_v60 = vpop.f32.mrf.mxu2  ;;  %v1205_v20 = vadd.f32 %v3904_v44, %v1140_v13  ;;  %v1957_v46 = vld [vmem:[%s4454_s5 + $0x38] sm:$0xff] }
 0x24d   : > { %1994 = vmatpush.msra.mxu2 %v1957_v46  ;;  %v1973_v44 = vld [vmem:[%s4454_s5 + $0xb8] sm:$0xff] }
 0x24e   : > { %v1563_v54 = vmax.f32 %v1518_v29, 0.0  ;;  %v1402_v21 = vpop.f32.mrf.mxu3  ;;  %v1270_v23 = vadd.f32 %v3907_v7, %v1205_v20  ;;  %2059 = vmatpush.msra.mxu3 %v1973_v44  ;;  %v1956_v7 = vld [vmem:[%s4454_s5 + $0x30] sm:$0xff] }
 0x24f   : > { %1995 = vmatpush.msra.mxu2 %v1956_v7  ;;  %v4558_v7 = vmax.f32 %v3972_v32, 0.0 }
 0x250   : > { %1748 = vmatmul.f32.gmra.mxu3 %v1563_v54  ;;  %1878 = vmatmul.f32.gmra.mxu1 %v1563_v54  ;;  %v1335_v48 = vadd.f32 %v4130_v10, %v1270_v23  ;;  %v4551_v54 = vmax.f32 %v3860_v61, 0.0  ;;  %v4552_v10 = vld [vmem:[#allocation25_spill] sm:$0xff]  ;;  %v4557_v23 = vmax.f32 %v3943_v17, 0.0 }
 0x251   : > { %v1455_v36 = vpop.f32.mrf.mxu0  ;;  %v1146_v63 = vadd.f32 %v4552_v10, %v4081_v38 }
 0x252   : > { %v1456_v26 = vadd.f32 %v1455_v36, %v1391_v8  ;;  %v1208_v8 = vadd.f32 %v3933_v2, %v1143_v31  ;;  %v1400_v35 = vadd.f32 %v1399_v43, %v1335_v48  ;;  %v1972_v2 = vld [vmem:[%s4454_s5 + $0xb0] sm:$0xff] }
 0x253   : > { %v1520_v11 = vpop.f32.mrf.mxu1  ;;  %2060 = vmatpush.msra.mxu3 %v1972_v2 }
 0x254   : > { %v1521_v42 = vadd.f32 %v1520_v11, %v1456_v26  ;;  %1816 = vmatmul.f32.gmra.mxu0 %v4549_v39  ;;  %v4236_v36 = vpop.f32.mrf.mxu2  ;;  %v1273_v61 = vadd.f32 %v3936_v27, %v1208_v8  ;;  %v1211_v39 = vadd.f32 %v3958_v56, %v1146_v63  ;;  %v1955_v27 = vld [vmem:[%s4454_s5 + $0x28] sm:$0xff] }
 0x255   : > { %1996 = vmatpush.msra.mxu2 %v1955_v27  ;;  %v1971_v56 = vld [vmem:[%s4454_s5 + $0xa8] sm:$0xff] }
 0x256   : > { %v1565_v57 = vmax.f32 %v1521_v42, 0.0  ;;  %v1405_v19 = vpop.f32.mrf.mxu3  ;;  %v1338_v11 = vadd.f32 %v4181_v0, %v1273_v61  ;;  %v4553_v42 = vmax.f32 %v3885_v24, 0.0  ;;  %v4554_v0 = vld [vmem:[#allocation26_spill] sm:$0xff]  ;;  %v1276_v24 = vadd.f32 %v3965_v3, %v1211_v39  ;;  %2061 = vmatpush.msra.mxu3 %v1971_v56  ;;  %v1954_v3 = vld [vmem:[%s4454_s5 + $0x20] sm:$0xff] }
 0x257   : > { %v1149_v4 = vadd.f32 %v4554_v0, %v4081_v38  ;;  %1997 = vmatpush.msra.mxu2 %v1954_v3  ;;  %v4564_v56 = vld [vmem:[#allocation6_spill] sm:$0xff]  ;;  %v4567_v3 = vld [vmem:[#allocation12_spill] sm:$0xff] }
 0x258   : > { %1751 = vmatmul.f32.gmra.mxu3 %v1565_v57  ;;  %1881 = vmatmul.f32.gmra.mxu1 %v1565_v57  ;;  %v1403_v12 = vadd.f32 %v1402_v21, %v1338_v11 }
 0x259   : > { %v1458_v18 = vpop.f32.mrf.mxu0  ;;  %v1214_v28 = vadd.f32 %v3987_v52, %v1149_v4 }
 0x25a   : > { %v1459_v14 = vadd.f32 %v1458_v18, %v1394_v53 }
 0x25b   : > { %v1523_v1 = vpop.f32.mrf.mxu1 }
 0x25c   : > { %v1524_v33 = vadd.f32 %v1523_v1, %v1459_v14  ;;  %1819 = vmatmul.f32.gmra.mxu0 %v4550_v50  ;;  %v4254_v57 = vpop.f32.mrf.mxu2  ;;  %v1341_v14 = vadd.f32 %v4202_v49, %v1276_v24  ;;  %v4555_v1 = vmax.f32 %v3914_v51, 0.0  ;;  %v1279_v49 = vadd.f32 %v3990_v37, %v1214_v28  ;;  %v1970_v51 = vld [vmem:[%s4454_s5 + $0xa0] sm:$0xff]  ;;  %v1953_v37 = vld [vmem:[%s4454_s5 + $0x18] sm:$0xff] }
 0x25d   : > { %2062 = vmatpush.msra.mxu3 %v1970_v51  ;;  %1998 = vmatpush.msra.mxu2 %v1953_v37 }
 0x25e   : > { %v1567_v62 = vmax.f32 %v1524_v33, 0.0  ;;  %v1408_v13 = vpop.f32.mrf.mxu3  ;;  %v1406_v50 = vadd.f32 %v1405_v19, %v1341_v14  ;;  %v1967_v14 = vld [vmem:[%s4454_s5 + $0x88] sm:$0xff] }
 0x260   : > { %1754 = vmatmul.f32.gmra.mxu3 %v1567_v62  ;;  %1884 = vmatmul.f32.gmra.mxu1 %v1567_v62  ;;  %v4556_v62 = vld [vmem:[#allocation27_spill] sm:$0xff] }
 0x261   : > { %v1461_v5 = vpop.f32.mrf.mxu0  ;;  %v1152_v21 = vadd.f32 %v4556_v62, %v4081_v38 }
 0x262   : > { %v1462_v29 = vadd.f32 %v1461_v5, %v1397_v16  ;;  %v1344_v5 = vadd.f32 %v4220_v60, %v1279_v49  ;;  %v1155_v60 = vadd.f32 %v3894_v59, %v4081_v38  ;;  %v1950_v49 = vld [vmem:[%s4454_s5] sm:$0xff] }
 0x263   : > { %v1526_v55 = vpop.f32.mrf.mxu1  ;;  %v1217_v44 = vadd.f32 %v4016_v9, %v1152_v21  ;;  %v1969_v9 = vld [vmem:[%s4454_s5 + $0x98] sm:$0xff] }
 0x264   : > { %v1527_v25 = vadd.f32 %v1526_v55, %v1462_v29  ;;  %1822 = vmatmul.f32.gmra.mxu0 %v4551_v54  ;;  %v1352_v52 = vpop.f32.mrf.mxu2  ;;  %v1409_v48 = vadd.f32 %v1408_v13, %v1344_v5  ;;  %2063 = vmatpush.msra.mxu3 %v1969_v9 }
 0x265   : > { %v1282_v54 = vadd.f32 %v4019_v30, %v1217_v44  ;;  %v1952_v30 = vld [vmem:[%s4454_s5 + $0x10] sm:$0xff] }
 0x266   : > { %v1569_v45 = vmax.f32 %v1527_v25, 0.0  ;;  %v1411_v29 = vpop.f32.mrf.mxu3  ;;  %1999 = vmatpush.msra.mxu2 %v1952_v30 }
 0x268   : > { %1757 = vmatmul.f32.gmra.mxu3 %v1569_v45  ;;  %1887 = vmatmul.f32.gmra.mxu1 %v1569_v45  ;;  %v1347_v45 = vadd.f32 %v4236_v36, %v1282_v54  ;;  %v4559_v36 = vld [vmem:[#allocation28_spill] sm:$0xff] }
 0x269   : > { %v1464_v22 = vpop.f32.mrf.mxu0 }
 0x26a   : > { %v1465_v26 = vadd.f32 %v1464_v22, %v1400_v35  ;;  %v1220_v22 = vadd.f32 %v4045_v47, %v1155_v60  ;;  %v1412_v63 = vadd.f32 %v1411_v29, %v1347_v45  ;;  %v1968_v47 = vld [vmem:[%s4454_s5 + $0x90] sm:$0xff] }
 0x26b   : > { %v1529_v15 = vpop.f32.mrf.mxu1  ;;  %2064 = vmatpush.msra.mxu3 %v1968_v47  ;;  %v4572_v45 = vld [vmem:[#allocation7_spill] sm:$0xff]  ;;  %v4575_v47 = vld [vmem:[#allocation8_spill] sm:$0xff] }
 0x26c   : > { %v1530_v6 = vadd.f32 %v1529_v15, %v1465_v26  ;;  %1825 = vmatmul.f32.gmra.mxu0 %v4553_v42  ;;  %v1355_v19 = vpop.f32.mrf.mxu2  ;;  %v1158_v26 = vadd.f32 %v4559_v36, %v4081_v38  ;;  %v1285_v32 = vadd.f32 %v4048_v40, %v1220_v22  ;;  %v4560_v42 = vld [vmem:[#allocation31_spill] sm:$0xff]  ;;  %v1951_v40 = vld [vmem:[%s4454_s5 + $0x8] sm:$0xff] }
 0x26d   : > { %v4561_v39 = vmax.f32 %v4560_v42, 0.0  ;;  %2000 = vmatpush.msra.mxu2 %v1951_v40  ;;  %2065 = vmatpush.msra.mxu3 %v1967_v14  ;;  %v1652_v42 = vld [vmem:[%s4453_s4] sm:$0x3] }
 0x26e   : > { %v1571_v43 = vmax.f32 %v1530_v6, 0.0  ;;  %v1414_v59 = vpop.f32.mrf.mxu3  ;;  %v1350_v11 = vadd.f32 %v4254_v57, %v1285_v32  ;;  %v4563_v57 = vld [vmem:[#allocation29_spill] sm:$0xff] }
 0x26f   : > { %2001 = vmatpush.msra.mxu2 %v1950_v49 }
 0x270   : > { %1760 = vmatmul.f32.gmra.mxu3 %v1571_v43  ;;  %1890 = vmatmul.f32.gmra.mxu1 %v1571_v43  ;;  %v4562_v43 = vld [vmem:[#allocation22_spill] sm:$0xff]  ;;  %v1415_v0 = vadd.f32 %v1414_v59, %v1350_v11 }
 0x271   : > { %v1467_v53 = vpop.f32.mrf.mxu0 }
 0x272   : > { %v1468_v18 = vadd.f32 %v1467_v53, %v1403_v12  ;;  %v1223_v12 = vadd.f32 %v4562_v43, %v1158_v26 }
 0x273   : > { %v1532_v41 = vpop.f32.mrf.mxu1 }
 0x274   : > { %v1533_v34 = vadd.f32 %v1532_v41, %v1468_v18  ;;  %1828 = vmatmul.f32.gmra.mxu0 %v4555_v1  ;;  %v1358_v53 = vpop.f32.mrf.mxu2  ;;  %v1161_v18 = vadd.f32 %v4563_v57, %v4081_v38  ;;  %v1288_v13 = vadd.f32 %v4564_v56, %v1223_v12 }
 0x276   : > { %v1573_v33 = vmax.f32 %v1533_v34, 0.0  ;;  %v1417_v4 = vpop.f32.mrf.mxu3  ;;  %v1353_v1 = vadd.f32 %v1352_v52, %v1288_v13  ;;  %v1966_v52 = vld [vmem:[%s4454_s5 + $0x80] sm:$0xff] }
 0x277   : > { %2066 = vmatpush.msra.mxu3 %v1966_v52 }
 0x278   : > { %1763 = vmatmul.f32.gmra.mxu3 %v1573_v33  ;;  %1893 = vmatmul.f32.gmra.mxu1 %v1573_v33  ;;  %v4565_v33 = vld [vmem:[#allocation32_spill] sm:$0xff]  ;;  %v1418_v21 = vadd.f32 %v1417_v4, %v1353_v1 }
 0x279   : > { %v1470_v20 = vpop.f32.mrf.mxu0 }
 0x27a   : > { %v1471_v16 = vadd.f32 %v1470_v20, %v1406_v50  ;;  %v4566_v50 = vmax.f32 %v4565_v33, 0.0  ;;  %v1226_v20 = vadd.f32 %v4567_v3, %v1161_v18 }
 0x27b   : > { %v1535_v46 = vpop.f32.mrf.mxu1 }
 0x27c   : > { %v1536_v31 = vadd.f32 %v1535_v46, %v1471_v16  ;;  %1831 = vmatmul.f32.gmra.mxu0 %v4557_v23  ;;  %v1675_v16 = vpop.f32.mrf.mxu2  ;;  %v4568_v46 = vld [vmem:[#allocation30_spill] sm:$0xff] }
 0x27d   : > { %v1164_v5 = vadd.f32 %v4568_v46, %v4081_v38 }
 0x27e   : > { %v1575_v55 = vmax.f32 %v1536_v31, 0.0  ;;  %v4569_v31 = vld [vmem:[#allocation23_spill] sm:$0xff]  ;;  %v1420_v44 = vpop.f32.mrf.mxu3 }
 0x27f   : > { %v1291_v23 = vadd.f32 %v4569_v31, %v1226_v20  ;;  %v1229_v54 = vadd.f32 %v4118_v58, %v1164_v5 }
 0x280   : > { %1766 = vmatmul.f32.gmra.mxu3 %v1575_v55  ;;  %1896 = vmatmul.f32.gmra.mxu1 %v1575_v55 }
 0x281   : > { %v1473_v25 = vpop.f32.mrf.mxu0  ;;  %v1294_v38 = vadd.f32 %v4572_v45, %v1229_v54 }
 0x282   : > { %v1474_v17 = vadd.f32 %v1473_v25, %v1409_v48  ;;  %v1356_v48 = vadd.f32 %v1355_v19, %v1291_v23  ;;  %v4570_v25 = vld [vmem:[#allocation20_spill] sm:$0xff] }
 0x283   : > { %v1538_v8 = vpop.f32.mrf.mxu1  ;;  %v4571_v60 = vmax.f32 %v4570_v25, 0.0 }
 0x284   : > { %v1539_v35 = vadd.f32 %v1538_v8, %v1474_v17  ;;  %1834 = vmatmul.f32.gmra.mxu0 %v4558_v7  ;;  %v1421_v9 = vadd.f32 %v1420_v44, %v1356_v48  ;;  %v1678_v7 = vpop.f32.mrf.mxu2 }
 0x286   : > { %v1577_v10 = vmax.f32 %v1539_v35, 0.0  ;;  %v1423_v30 = vpop.f32.mrf.mxu3 }
 0x288   : > { %1769 = vmatmul.f32.gmra.mxu3 %v1577_v10  ;;  %1899 = vmatmul.f32.gmra.mxu1 %v1577_v10  ;;  %v1359_v10 = vadd.f32 %v1358_v53, %v1294_v38  ;;  %v4340_v53 = vperm.slane %v1652_v42, 0 }
 0x289   : > { %v1476_v61 = vpop.f32.mrf.mxu0 }
 0x28a   : > { %v1477_v2 = vadd.f32 %v1476_v61, %v1412_v63  ;;  %v4573_v63 = vld [vmem:[#allocation5_spill] sm:$0xff]  ;;  %v1424_v36 = vadd.f32 %v1423_v30, %v1359_v10  ;;  %v1676_v57 = vadd.f32 %v1675_v16, %v4340_v53 }
 0x28b   : > { %v1541_v15 = vpop.f32.mrf.mxu1  ;;  %v4574_v19 = vmax.f32 %v4573_v63, 0.0 }
 0x28c   : > { %v1542_v6 = vadd.f32 %v1541_v15, %v1477_v2  ;;  %1837 = vmatmul.f32.gmra.mxu0 %v4561_v39  ;;  %v4576_v15 = vmax.f32 %v4575_v47, 0.0  ;;  %v1681_v11 = vpop.f32.mrf.mxu2  ;;  %v4337_v39 = vperm.slane %v1652_v42, 1 }
 0x28d   : > { %v1682_v46 = vadd.f32 %v1681_v11, %v4340_v53 }
 0x28e   : > { %v1579_v27 = vmax.f32 %v1542_v6, 0.0 }
 0x290   : > { %1772 = vmatmul.f32.gmra.mxu3 %v1579_v27  ;;  %1902 = vmatmul.f32.gmra.mxu1 %v1579_v27 }
 0x291   : > { %v1479_v24 = vpop.f32.mrf.mxu0 }
 0x292   : > { %v1480_v41 = vadd.f32 %v1479_v24, %v1415_v0 }
 0x293   : > { %v1544_v34 = vpop.f32.mrf.mxu1 }
 0x294   : > { %v1545_v28 = vadd.f32 %v1544_v34, %v1480_v41  ;;  %1840 = vmatmul.f32.gmra.mxu0 %v4566_v50  ;;  %v1684_v40 = vpop.f32.mrf.mxu2  ;;  %v1679_v50 = vadd.f32 %v1678_v7, %v4340_v53 }
 0x296   : > { %v1581_v62 = vmax.f32 %v1545_v28, 0.0 }
 0x298   : > { %1775 = vmatmul.f32.gmra.mxu3 %v1581_v62  ;;  %1905 = vmatmul.f32.gmra.mxu1 %v1581_v62 }
 0x299   : > { %v1482_v51 = vpop.f32.mrf.mxu0 }
 0x29a   : > { %v1483_v29 = vadd.f32 %v1482_v51, %v1418_v21 }
 0x29b   : > { %v1547_v55 = vpop.f32.mrf.mxu1 }
 0x29c   : > { %v1548_v37 = vadd.f32 %v1547_v55, %v1483_v29  ;;  %1843 = vmatmul.f32.gmra.mxu0 %v4571_v60  ;;  %v1687_v28 = vpop.f32.mrf.mxu2  ;;  %v1685_v60 = vadd.f32 %v1684_v40, %v4340_v53 }
 0x29d   : > { %v1688_v10 = vadd.f32 %v1687_v28, %v4340_v53 }
 0x29e   : > { %v1583_v17 = vmax.f32 %v1548_v37, 0.0 }
 0x2a0   : > { %1778 = vmatmul.f32.gmra.mxu3 %v1583_v17  ;;  %1908 = vmatmul.f32.gmra.mxu1 %v1583_v17 }
 0x2a1   : > { %v1485_v8 = vpop.f32.mrf.mxu0 }
 0x2a2   : > { %v1486_v35 = vadd.f32 %v1485_v8, %v1421_v9 }
 0x2a3   : > { %v1550_v22 = vpop.f32.mrf.mxu1 }
 0x2a4   : > { %v1551_v59 = vadd.f32 %v1550_v22, %v1486_v35  ;;  %1846 = vmatmul.f32.gmra.mxu0 %v4574_v19  ;;  %v1690_v5 = vpop.f32.mrf.mxu2 }
 0x2a6   : > { %v1585_v61 = vmax.f32 %v1551_v59, 0.0 }
 0x2a8   : > { %1781 = vmatmul.f32.gmra.mxu3 %v1585_v61  ;;  %1911 = vmatmul.f32.gmra.mxu1 %v1585_v61 }
 0x2a9   : > { %v1488_v58 = vpop.f32.mrf.mxu0 }
 0x2aa   : > { %v1489_v26 = vadd.f32 %v1488_v58, %v1424_v36 }
 0x2ab   : > { %v1553_v32 = vpop.f32.mrf.mxu1 }
 0x2ac   : > { %v1554_v2 = vadd.f32 %v1553_v32, %v1489_v26  ;;  %1849 = vmatmul.f32.gmra.mxu0 %v4576_v15  ;;  %v1693_v8 = vpop.f32.mrf.mxu2 }
 0x2ad   : > { %v1694_v40 = vadd.f32 %v1693_v8, %v4340_v53 }
 0x2ae   : > { %v1587_v6 = vmax.f32 %v1554_v2, 0.0  ;;  %v1691_v2 = vadd.f32 %v1690_v5, %v4340_v53 }
 0x2b0   : > { %1784 = vmatmul.f32.gmra.mxu3 %v1587_v6  ;;  %1914 = vmatmul.f32.gmra.mxu1 %v1587_v6 }
 0x2b1   : > { %v1805_v43 = vpop.f32.mrf.mxu0 }
 0x2b2   : > { %v1806_v12 = vadd.f32 %v1805_v43, %v4337_v39 }
 0x2b4   : > { %v1696_v58 = vpop.f32.mrf.mxu2 }
 0x2b5   : > { %v1870_v27 = vpop.f32.mrf.mxu1 }
 0x2b6   : > { %v1871_v0 = vadd.f32 %v1870_v27, %v1806_v12 }
 0x2b8   : > { %v1919_v4 = vmax.f32 %v1871_v0, 0.0 }
 0x2b9   : > { %v1808_v24 = vpop.f32.mrf.mxu0 }
 0x2ba   : > { %2067 = vmatmul.f32.vlgmr.msra.gmra.mxu3 %v1919_v4  ;;  %v1809_v56 = vadd.f32 %v1808_v24, %v4337_v39 }
 0x2bb   : > { %v1740_v18 = vpop.f32.mrf.mxu3 }
 0x2bc   : > { %v1741_v13 = vadd.f32 %v1740_v18, %v1676_v57  ;;  %v1699_v27 = vpop.f32.mrf.mxu2 }
 0x2bd   : > { %v1873_v41 = vpop.f32.mrf.mxu1 }
 0x2be   : > { %v1918_v14 = vmax.f32 %v1741_v13, 0.0  ;;  %v1874_v34 = vadd.f32 %v1873_v41, %v1809_v56 }
 0x2c0   : > { %v1921_v1 = vmax.f32 %v1874_v34, 0.0  ;;  %2002 = vmatmul.f32.vlgmr.msra.gmra.mxu2 %v1918_v14  ;;  %v1697_v34 = vadd.f32 %v1696_v58, %v4340_v53 }
 0x2c1   : > { %v1811_v33 = vpop.f32.mrf.mxu0 }
 0x2c2   : > { %2070 = vmatmul.f32.gmra.mxu3 %v1921_v1  ;;  %v1812_v20 = vadd.f32 %v1811_v33, %v4337_v39 }
 0x2c3   : > { %v1743_v3 = vpop.f32.mrf.mxu3 }
 0x2c4   : > { %v1744_v62 = vadd.f32 %v1743_v3, %v1679_v50  ;;  %v1702_v1 = vpop.f32.mrf.mxu2 }
 0x2c5   : > { %v1876_v21 = vpop.f32.mrf.mxu1 }
 0x2c6   : > { %v1920_v49 = vmax.f32 %v1744_v62, 0.0  ;;  %v1877_v16 = vadd.f32 %v1876_v21, %v1812_v20 }
 0x2c8   : > { %v1923_v51 = vmax.f32 %v1877_v16, 0.0  ;;  %2005 = vmatmul.f32.gmra.mxu2 %v1920_v49  ;;  %v1700_v16 = vadd.f32 %v1699_v27, %v4340_v53 }
 0x2c9   : > { %v1814_v52 = vpop.f32.mrf.mxu0 }
 0x2ca   : > { %2073 = vmatmul.f32.gmra.mxu3 %v1923_v51  ;;  %v1815_v23 = vadd.f32 %v1814_v52, %v4337_v39 }
 0x2cb   : > { %v1746_v31 = vpop.f32.mrf.mxu3 }
 0x2cc   : > { %v1747_v29 = vadd.f32 %v1746_v31, %v1682_v46  ;;  %v1705_v5 = vpop.f32.mrf.mxu2 }
 0x2cd   : > { %v1879_v44 = vpop.f32.mrf.mxu1 }
 0x2ce   : > { %v1922_v55 = vmax.f32 %v1747_v29, 0.0  ;;  %v1880_v48 = vadd.f32 %v1879_v44, %v1815_v23 }
 0x2d0   : > { %v1925_v37 = vmax.f32 %v1880_v48, 0.0  ;;  %2008 = vmatmul.f32.gmra.mxu2 %v1922_v55  ;;  %v1703_v48 = vadd.f32 %v1702_v1, %v4340_v53 }
 0x2d1   : > { %v1817_v25 = vpop.f32.mrf.mxu0 }
 0x2d2   : > { %2076 = vmatmul.f32.gmra.mxu3 %v1925_v37  ;;  %v1818_v17 = vadd.f32 %v1817_v25, %v4337_v39 }
 0x2d3   : > { %v1749_v54 = vpop.f32.mrf.mxu3 }
 0x2d4   : > { %v1750_v9 = vadd.f32 %v1749_v54, %v1685_v60  ;;  %v1708_v8 = vpop.f32.mrf.mxu2 }
 0x2d5   : > { %v1882_v45 = vpop.f32.mrf.mxu1  ;;  %v1709_v58 = vadd.f32 %v1708_v8, %v4340_v53 }
 0x2d6   : > { %v1924_v38 = vmax.f32 %v1750_v9, 0.0  ;;  %v1883_v35 = vadd.f32 %v1882_v45, %v1818_v17 }
 0x2d8   : > { %v1927_v7 = vmax.f32 %v1883_v35, 0.0  ;;  %2011 = vmatmul.f32.gmra.mxu2 %v1924_v38  ;;  %v1706_v35 = vadd.f32 %v1705_v5, %v4340_v53 }
 0x2d9   : > { %v1820_v22 = vpop.f32.mrf.mxu0 }
 0x2da   : > { %2079 = vmatmul.f32.gmra.mxu3 %v1927_v7  ;;  %v1821_v63 = vadd.f32 %v1820_v22, %v4337_v39 }
 0x2db   : > { %v1752_v59 = vpop.f32.mrf.mxu3 }
 0x2dc   : > { %v1753_v19 = vadd.f32 %v1752_v59, %v1688_v10 }
 0x2dd   : > { %v1885_v30 = vpop.f32.mrf.mxu1 }
 0x2de   : > { %v1926_v61 = vmax.f32 %v1753_v19, 0.0  ;;  %v1886_v36 = vadd.f32 %v1885_v30, %v1821_v63 }
 0x2e0   : > { %v1929_v26 = vmax.f32 %v1886_v36, 0.0  ;;  %2014 = vmatmul.f32.gmra.mxu2 %v1926_v61  ;;  %v1711_v61 = vpop.f32.mrf.mxu2 }
 0x2e1   : > { %v1823_v32 = vpop.f32.mrf.mxu0 }
 0x2e2   : > { %2082 = vmatmul.f32.gmra.mxu3 %v1929_v26  ;;  %v1824_v15 = vadd.f32 %v1823_v32, %v4337_v39 }
 0x2e3   : > { %v1755_v47 = vpop.f32.mrf.mxu3 }
 0x2e4   : > { %v1756_v11 = vadd.f32 %v1755_v47, %v1691_v2 }
 0x2e5   : > { %v1888_v6 = vpop.f32.mrf.mxu1 }
 0x2e6   : > { %v1928_v42 = vmax.f32 %v1756_v11, 0.0  ;;  %v1889_v43 = vadd.f32 %v1888_v6, %v1824_v15 }
 0x2e8   : > { %v1931_v12 = vmax.f32 %v1889_v43, 0.0  ;;  %2017 = vmatmul.f32.gmra.mxu2 %v1928_v42  ;;  %v1712_v43 = vadd.f32 %v1711_v61, %v4340_v53 }
 0x2e9   : > { %v1826_v0 = vpop.f32.mrf.mxu0 }
 0x2ea   : > { %2085 = vmatmul.f32.gmra.mxu3 %v1931_v12  ;;  %v1827_v24 = vadd.f32 %v1826_v0, %v4337_v39  ;;  %v1714_v12 = vpop.f32.mrf.mxu2 }
 0x2eb   : > { %v1758_v4 = vpop.f32.mrf.mxu3 }
 0x2ec   : > { %v1759_v57 = vadd.f32 %v1758_v4, %v1694_v40 }
 0x2ed   : > { %v1891_v18 = vpop.f32.mrf.mxu1 }
 0x2ee   : > { %v1930_v56 = vmax.f32 %v1759_v57, 0.0  ;;  %v1892_v13 = vadd.f32 %v1891_v18, %v1827_v24 }
 0x2f0   : > { %v1933_v41 = vmax.f32 %v1892_v13, 0.0  ;;  %2020 = vmatmul.f32.gmra.mxu2 %v1930_v56  ;;  %v1715_v13 = vadd.f32 %v1714_v12, %v4340_v53 }
 0x2f1   : > { %v1829_v14 = vpop.f32.mrf.mxu0 }
 0x2f2   : > { %2088 = vmatmul.f32.gmra.mxu3 %v1933_v41  ;;  %v1830_v33 = vadd.f32 %v1829_v14, %v4337_v39  ;;  %v1717_v1 = vpop.f32.mrf.mxu2 }
 0x2f3   : > { %v1761_v28 = vpop.f32.mrf.mxu3 }
 0x2f4   : > { %v1762_v50 = vadd.f32 %v1761_v28, %v1697_v34 }
 0x2f5   : > { %v1894_v3 = vpop.f32.mrf.mxu1 }
 0x2f6   : > { %v1932_v20 = vmax.f32 %v1762_v50, 0.0  ;;  %v1895_v62 = vadd.f32 %v1894_v3, %v1830_v33 }
 0x2f8   : > { %v1935_v21 = vmax.f32 %v1895_v62, 0.0  ;;  %2023 = vmatmul.f32.gmra.mxu2 %v1932_v20  ;;  %v1718_v62 = vadd.f32 %v1717_v1, %v4340_v53 }
 0x2f9   : > { %v1832_v49 = vpop.f32.mrf.mxu0 }
 0x2fa   : > { %2091 = vmatmul.f32.gmra.mxu3 %v1935_v21  ;;  %v1833_v52 = vadd.f32 %v1832_v49, %v4337_v39  ;;  %v1720_v5 = vpop.f32.mrf.mxu2 }
 0x2fb   : > { %v1764_v51 = vpop.f32.mrf.mxu3 }
 0x2fc   : > { %v1765_v46 = vadd.f32 %v1764_v51, %v1700_v16 }
 0x2fd   : > { %v1897_v31 = vpop.f32.mrf.mxu1 }
 0x2fe   : > { %v1934_v23 = vmax.f32 %v1765_v46, 0.0  ;;  %v1898_v29 = vadd.f32 %v1897_v31, %v1833_v52 }
 0x300   : > { %v1937_v44 = vmax.f32 %v1898_v29, 0.0  ;;  %2026 = vmatmul.f32.gmra.mxu2 %v1934_v23  ;;  %v1721_v23 = vadd.f32 %v1720_v5, %v4340_v53 }
 0x301   : > { %v1835_v55 = vpop.f32.mrf.mxu0 }
 0x302   : > { %2094 = vmatmul.f32.gmra.mxu3 %v1937_v44  ;;  %v1836_v25 = vadd.f32 %v1835_v55, %v4337_v39 }
 0x303   : > { %v1767_v37 = vpop.f32.mrf.mxu3 }
 0x304   : > { %v1768_v60 = vadd.f32 %v1767_v37, %v1703_v48 }
 0x305   : > { %v1900_v54 = vpop.f32.mrf.mxu1 }
 0x306   : > { %v1936_v17 = vmax.f32 %v1768_v60, 0.0  ;;  %v1901_v9 = vadd.f32 %v1900_v54, %v1836_v25 }
 0x308   : > { %v1939_v45 = vmax.f32 %v1901_v9, 0.0  ;;  %2029 = vmatmul.f32.gmra.mxu2 %v1936_v17 }
 0x309   : > { %v1838_v38 = vpop.f32.mrf.mxu0 }
 0x30a   : > { %2097 = vmatmul.f32.gmra.mxu3 %v1939_v45  ;;  %v1839_v22 = vadd.f32 %v1838_v38, %v4337_v39 }
 0x30b   : > { %v1770_v7 = vpop.f32.mrf.mxu3 }
 0x30c   : > { %v1771_v10 = vadd.f32 %v1770_v7, %v1706_v35 }
 0x30d   : > { %v1903_v59 = vpop.f32.mrf.mxu1 }
 0x30e   : > { %v1938_v63 = vmax.f32 %v1771_v10, 0.0  ;;  %v1904_v19 = vadd.f32 %v1903_v59, %v1839_v22 }
 0x310   : > { %v1941_v30 = vmax.f32 %v1904_v19, 0.0  ;;  %2032 = vmatmul.f32.gmra.mxu2 %v1938_v63 }
 0x311   : > { %v1841_v36 = vpop.f32.mrf.mxu0 }
 0x312   : > { %2100 = vmatmul.f32.gmra.mxu3 %v1941_v30  ;;  %v1842_v32 = vadd.f32 %v1841_v36, %v4337_v39 }
 0x313   : > { %v1773_v26 = vpop.f32.mrf.mxu3 }
 0x314   : > { %v1774_v2 = vadd.f32 %v1773_v26, %v1709_v58 }
 0x315   : > { %v1906_v47 = vpop.f32.mrf.mxu1 }
 0x316   : > { %v1940_v15 = vmax.f32 %v1774_v2, 0.0  ;;  %v1907_v11 = vadd.f32 %v1906_v47, %v1842_v32 }
 0x318   : > { %v1943_v6 = vmax.f32 %v1907_v11, 0.0  ;;  %2035 = vmatmul.f32.gmra.mxu2 %v1940_v15 }
 0x319   : > { %v1844_v42 = vpop.f32.mrf.mxu0 }
 0x31a   : > { %2103 = vmatmul.f32.gmra.mxu3 %v1943_v6  ;;  %v1845_v0 = vadd.f32 %v1844_v42, %v4337_v39 }
 0x31b   : > { %v1776_v27 = vpop.f32.mrf.mxu3 }
 0x31c   : > { %v1777_v40 = vadd.f32 %v1776_v27, %v1712_v43 }
 0x31d   : > { %v1909_v4 = vpop.f32.mrf.mxu1 }
 0x31e   : > { %v1942_v24 = vmax.f32 %v1777_v40, 0.0  ;;  %v1910_v57 = vadd.f32 %v1909_v4, %v1845_v0 }
 0x320   : > { %v1945_v18 = vmax.f32 %v1910_v57, 0.0  ;;  %2038 = vmatmul.f32.gmra.mxu2 %v1942_v24 }
 0x321   : > { %v1847_v56 = vpop.f32.mrf.mxu0 }
 0x322   : > { %2106 = vmatmul.f32.gmra.mxu3 %v1945_v18  ;;  %v1848_v14 = vadd.f32 %v1847_v56, %v4337_v39 }
 0x323   : > { %v1779_v41 = vpop.f32.mrf.mxu3 }
 0x324   : > { %v1780_v34 = vadd.f32 %v1779_v41, %v1715_v13 }
 0x325   : > { %v1912_v28 = vpop.f32.mrf.mxu1 }
 0x326   : > { %v1944_v33 = vmax.f32 %v1780_v34, 0.0  ;;  %v1913_v50 = vadd.f32 %v1912_v28, %v1848_v14 }
 0x328   : > { %v1947_v3 = vmax.f32 %v1913_v50, 0.0  ;;  %2041 = vmatmul.f32.gmra.mxu2 %v1944_v33 }
 0x329   : > { %v1850_v20 = vpop.f32.mrf.mxu0 }
 0x32a   : > { %2109 = vmatmul.f32.gmra.mxu3 %v1947_v3  ;;  %v1851_v49 = vadd.f32 %v1850_v20, %v4337_v39  ;;  %v4377_v39 = vld [vmem:[%s4455_s6] ss:$0 sm:$0xff] }
 0x32b   : > { %v1782_v21 = vpop.f32.mrf.mxu3 }
 0x32c   : > { %v1783_v16 = vadd.f32 %v1782_v21, %v1718_v62 }
 0x32d   : > { %v1915_v51 = vpop.f32.mrf.mxu1 }
 0x32e   : > { %v1946_v52 = vmax.f32 %v1783_v16, 0.0  ;;  %v1916_v46 = vadd.f32 %v1915_v51, %v1851_v49 }
 0x330   : > { %v1949_v31 = vmax.f32 %v1916_v46, 0.0  ;;  %2044 = vmatmul.f32.gmra.mxu2 %v1946_v52 }
 0x332   : > { %2112 = vmatmul.f32.gmra.mxu3 %v1949_v31 }
 0x333   : > { %v1785_v29 = vpop.f32.mrf.mxu3 }
 0x334   : > { %v1786_v44 = vadd.f32 %v1785_v29, %v1721_v23 }
 0x336   : > { %v1948_v55 = vmax.f32 %v1786_v44, 0.0 }
 0x338   : > { %2047 = vmatmul.f32.gmra.mxu2 %v1948_v55 }
 0x33d   : > { %v2068_v48 = vpop.f32.mrf.mxu3 }
 0x343   : > { %v2003_v37 = vpop.f32.mrf.mxu2 }
 0x344   : > { %v2004_v25 = vadd.f32 %v4377_v39, %v2003_v37 }
 0x345   : > { %v2071_v60 = vpop.f32.mrf.mxu3 }
 0x346   : > { %v2069_v54 = vadd.f32 %v2068_v48, %v2004_v25 }
 0x348   : > { %2116 = vst [vmem:[%s4382_s18] sm:$0xff] %v2069_v54 }
 0x34b   : > { %v2006_v53 = vpop.f32.mrf.mxu2 }
 0x34c   : > { %v2007_v17 = vadd.f32 %v4377_v39, %v2006_v53 }
 0x34d   : > { %v2074_v9 = vpop.f32.mrf.mxu3 }
 0x34e   : > { %v2072_v8 = vadd.f32 %v2071_v60, %v2007_v17 }
 0x350   : > { %2117 = vst [vmem:[%s4382_s18 + $0x8] sm:$0xff] %v2072_v8 }
 0x353   : > { %v2009_v45 = vpop.f32.mrf.mxu2 }
 0x354   : > { %v2010_v38 = vadd.f32 %v4377_v39, %v2009_v45 }
 0x355   : > { %v2077_v35 = vpop.f32.mrf.mxu3 }
 0x356   : > { %v2075_v7 = vadd.f32 %v2074_v9, %v2010_v38 }
 0x358   : > { %2118 = vst [vmem:[%s4382_s18 + $0x10] sm:$0xff] %v2075_v7 }
 0x35b   : > { %v2012_v22 = vpop.f32.mrf.mxu2 }
 0x35c   : > { %v2013_v10 = vadd.f32 %v4377_v39, %v2012_v22 }
 0x35d   : > { %v2080_v59 = vpop.f32.mrf.mxu3 }
 0x35e   : > { %v2078_v63 = vadd.f32 %v2077_v35, %v2013_v10 }
 0x360   : > { %2119 = vst [vmem:[%s4382_s18 + $0x18] sm:$0xff] %v2078_v63 }
 0x363   : > { %v2015_v19 = vpop.f32.mrf.mxu2 }
 0x364   : > { %v2016_v30 = vadd.f32 %v4377_v39, %v2015_v19 }
 0x365   : > { %v2083_v61 = vpop.f32.mrf.mxu3 }
 0x366   : > { %v2081_v36 = vadd.f32 %v2080_v59, %v2016_v30 }
 0x368   : > { %2120 = vst [vmem:[%s4382_s18 + $0x20] sm:$0xff] %v2081_v36 }
 0x36b   : > { %v2018_v58 = vpop.f32.mrf.mxu2 }
 0x36c   : > { %v2019_v26 = vadd.f32 %v4377_v39, %v2018_v58 }
 0x36d   : > { %v2086_v32 = vpop.f32.mrf.mxu3 }
 0x36e   : > { %v2084_v2 = vadd.f32 %v2083_v61, %v2019_v26 }
 0x370   : > { %2121 = vst [vmem:[%s4382_s18 + $0x28] sm:$0xff] %v2084_v2 }
 0x373   : > { %v2021_v47 = vpop.f32.mrf.mxu2 }
 0x374   : > { %v2022_v15 = vadd.f32 %v4377_v39, %v2021_v47 }
 0x375   : > { %v2089_v11 = vpop.f32.mrf.mxu3 }
 0x376   : > { %v2087_v6 = vadd.f32 %v2086_v32, %v2022_v15 }
 0x378   : > { %2122 = vst [vmem:[%s4382_s18 + $0x30] sm:$0xff] %v2087_v6 }
 0x37b   : > { %v2024_v42 = vpop.f32.mrf.mxu2 }
 0x37c   : > { %v2025_v43 = vadd.f32 %v4377_v39, %v2024_v42 }
 0x37d   : > { %v2092_v12 = vpop.f32.mrf.mxu3 }
 0x37e   : > { %v2090_v27 = vadd.f32 %v2089_v11, %v2025_v43 }
 0x380   : > { %2123 = vst [vmem:[%s4382_s18 + $0x38] sm:$0xff] %v2090_v27 }
 0x383   : > { %v2027_v0 = vpop.f32.mrf.mxu2 }
 0x384   : > { %v2028_v40 = vadd.f32 %v4377_v39, %v2027_v0 }
 0x385   : > { %v2095_v4 = vpop.f32.mrf.mxu3 }
 0x386   : > { %v2093_v24 = vadd.f32 %v2092_v12, %v2028_v40 }
 0x388   : > { %2124 = vst [vmem:[%s4382_s18 + $0x40] sm:$0xff] %v2093_v24 }
 0x38b   : > { %v2030_v57 = vpop.f32.mrf.mxu2 }
 0x38c   : > { %v2031_v18 = vadd.f32 %v4377_v39, %v2030_v57 }
 0x38d   : > { %v2098_v56 = vpop.f32.mrf.mxu3 }
 0x38e   : > { %v2096_v13 = vadd.f32 %v2095_v4, %v2031_v18 }
 0x390   : > { %2125 = vst [vmem:[%s4382_s18 + $0x48] sm:$0xff] %v2096_v13 }
 0x393   : > { %v2033_v41 = vpop.f32.mrf.mxu2 }
 0x394   : > { %v2034_v14 = vadd.f32 %v4377_v39, %v2033_v41 }
 0x395   : > { %v2101_v34 = vpop.f32.mrf.mxu3 }
 0x396   : > { %v2099_v1 = vadd.f32 %v2098_v56, %v2034_v14 }
 0x398   : > { %2126 = vst [vmem:[%s4382_s18 + $0x50] sm:$0xff] %v2099_v1 }
 0x39b   : > { %v2036_v28 = vpop.f32.mrf.mxu2 }
 0x39c   : > { %v2037_v33 = vadd.f32 %v4377_v39, %v2036_v28 }
 0x39d   : > { %v2104_v3 = vpop.f32.mrf.mxu3 }
 0x39e   : > { %v2102_v50 = vadd.f32 %v2101_v34, %v2037_v33 }
 0x3a0   : > { %2127 = vst [vmem:[%s4382_s18 + $0x58] sm:$0xff] %v2102_v50 }
 0x3a3   : > { %v2039_v20 = vpop.f32.mrf.mxu2 }
 0x3a4   : > { %v2040_v62 = vadd.f32 %v4377_v39, %v2039_v20 }
 0x3a5   : > { %v2107_v49 = vpop.f32.mrf.mxu3 }
 0x3a6   : > { %v2105_v21 = vadd.f32 %v2104_v3, %v2040_v62 }
 0x3a8   : > { %2128 = vst [vmem:[%s4382_s18 + $0x60] sm:$0xff] %v2105_v21 }
 0x3ab   : > { %v2042_v16 = vpop.f32.mrf.mxu2 }
 0x3ac   : > { %v2043_v51 = vadd.f32 %v4377_v39, %v2042_v16 }
 0x3ad   : > { %v2110_v46 = vpop.f32.mrf.mxu3 }
 0x3ae   : > { %v2108_v52 = vadd.f32 %v2107_v49, %v2043_v51 }
 0x3b0   : > { %2129 = vst [vmem:[%s4382_s18 + $0x68] sm:$0xff] %v2108_v52 }
 0x3b3   : > { %v2045_v5 = vpop.f32.mrf.mxu2 }
 0x3b4   : > { %v2046_v31 = vadd.f32 %v4377_v39, %v2045_v5 }
 0x3b5   : > { %v2113_v55 = vpop.f32.mrf.mxu3 }
 0x3b6   : > { %v2111_v23 = vadd.f32 %v2110_v46, %v2046_v31 }
 0x3b8   : > { %2130 = vst [vmem:[%s4382_s18 + $0x70] sm:$0xff] %v2111_v23 }
 0x3bb   : > { %v2048_v29 = vpop.f32.mrf.mxu2 }
 0x3bc   : > { %v2049_v44 = vadd.f32 %v4377_v39, %v2048_v29 }
 0x3be   : > { %v2114_v48 = vadd.f32 %v2113_v55, %v2049_v44 }
 0x3c0   : > { %2131 = vst [vmem:[%s4382_s18 + $0x78] sm:$0xff] %v2114_v48 }
 0x3c1   : > { %2395 = shalt.err (!%p2392_p3)
}
 0x3c2   : > { %s2432_s15 = smov 128   ;;  %s2433_s18 = smov 8  }
 0x3c3   : > { %2256 = dma.vmem_to_hbm [thread:$0]  (%p2512_p5), %s2146_s22, 2048, %s2148_s23, %s2133_s9, %s2432_s15, %s2432_s15, %s2433_s18  }
 0x3c4 PF: > { %p2262_p4 = scmp.ge.s32.totalorder %s2430_s27, 2  ;;  %s2162_s14 = sand.u32 1, %s2418_s24  }
 0x3c5   : > { %s2163_s21 = scalar_lea.sflag [#allocation3], %s2162_s14 }
 0x3c6   : > { %p2259_p7 = pnand %p2262_p4, %p2516_p6 }
 0x3c8   : > { %p2260_p8 = pneg %p2259_p7 }
 0x3ca   : > { %2413 = dma.done.wait (%p2260_p8), %s2163_s21, 2048  }
 0x3cb   : > { %2415 = vsyncadd (%p2260_p8), %s2163_s21, 4294965248  ;;  %p17_p9 = scmp.ge.s32.totalorder %s2499_s30, 4   ;;  %s4577_s24 = smov %s2422_s25 }
 0x3cc   : > { %s4578_s25 = smov %s2426_s26  ;;  %s4579_s26 = smov %s2510_s10 }
 0x3cd   : > { %s4580_s27 = smov %s2499_s30  ;;  %19 = sbr.rel (!%p17_p9) target bundleno = 3 (0x3), region = 83 }
 0x3d2   :  { %2169 = vsyncpa [#allocation3], 1 }
 0x3d3   :  { %2171 = vsyncpa [#allocation3 + $0x1], 1 }

</bundles_post_ra>
